<compile_context>
chip_gen: v5e
topology: v5e:2x2
jax: 0.10.0
libtpu: 0.0.40
codegen_flags: <defaults>
</compile_context>

<pallas_src>
import functools

import jax
import jax.numpy as jnp
from jax.experimental import pallas as pl
from jax.experimental.pallas import tpu as pltpu

_LANE = 128
_NEG_SLOPE = 0.1


# ----------------------------- small helpers --------------------------------

def _round_up(v, m):
    return (v + m - 1) // m * m


def _pick_tile(size, candidates):
    for c in candidates:
        if size % c == 0:
            return c
    return size


def _pick_tr(ho, wo, k_total):
    """Row tile: largest divisor of ho keeping the patch scratch modest and the
    MXU M-dim <= 1024; prefer >=2 row blocks when the map is tall (pipelining +
    megacore)."""
    for tr in (32, 16, 8, 4, 2, 1):
        if ho % tr:
            continue
        if tr >= ho and ho > 8:
            continue
        m = tr * wo
        if m <= 1024 and m * k_total * 2 <= 8 * 1024 * 1024:
            return tr
    return 1


def _compiler_params(dim_sems, working_set_bytes):
    # Generation-aware VMEM budget: ~96 MiB usable on v5e/v6e (128 MiB),
    # ~48 MiB on v7x (64 MiB).
    cap = 64 * 1024 * 1024
    try:
        info = pltpu.get_tpu_info()
        cap = int(getattr(info, "vmem_capacity_bytes", cap)) or cap
    except Exception:
        pass
    hi = (cap * 3) // 4
    limit = int(min(hi, max(32 * 1024 * 1024, 4 * int(working_set_bytes))))
    return pltpu.CompilerParams(dimension_semantics=dim_sems,
                                vmem_limit_bytes=limit)


def fold_bn(gamma, beta, mean, var, eps=1e-5):
    """Fold inference-mode BN into per-channel scale/shift."""
    scale = (gamma / jnp.sqrt(var + eps)).astype(jnp.float32)
    shift = (beta - mean * scale).astype(jnp.float32)
    return scale, shift


def _pad_vec(v, target, fill):
    pad = target - v.shape[0]
    if pad == 0:
        return v.astype(jnp.float32)
    return jnp.pad(v.astype(jnp.float32), (0, pad), constant_values=fill)


def _conv3x3_weight2d(w, cin_p, cout_p):
    # torch (Cout, Cin, 3, 3) -> (9*cin_p, cout_p), tap-major [dh][dw][cin]
    cout, cin = w.shape[0], w.shape[1]
    wt = jnp.transpose(w, (2, 3, 1, 0))                        # (3,3,cin,cout)
    wt = jnp.pad(wt, ((0, 0), (0, 0), (0, cin_p - cin), (0, cout_p - cout)))
    return wt.reshape(9 * cin_p, cout_p).astype(jnp.bfloat16)


def _conv3x3_weight_s2d(w, c4p, cout_p):
    # torch (Cout, Cin, 3, 3) -> 2x2-tap space-to-depth weights (2*2*c4p, cout_p)
    cout, cin = w.shape[0], w.shape[1]
    wt = jnp.transpose(w, (2, 3, 1, 0))                        # (3,3,cin,cout)
    wt4 = jnp.pad(wt, ((0, 1), (0, 1), (0, 0), (0, 0)))        # zero tap for dh/dw==3
    w6 = wt4.reshape(2, 2, 2, 2, cin, cout).transpose(0, 2, 1, 3, 4, 5)
    w4 = w6.reshape(2, 2, 4 * cin, cout)
    w4 = jnp.pad(w4, ((0, 0), (0, 0), (0, c4p - 4 * cin), (0, cout_p - cout)))
    return w4.reshape(4 * c4p, cout_p).astype(jnp.bfloat16)


def _conv1x1_weight(w, cin_p, cout_p):
    # torch (Cout, Cin, 1, 1) -> (cin_p, cout_p) bf16
    wt = jnp.transpose(w[:, :, 0, 0], (1, 0))
    wt = jnp.pad(wt, ((0, cin_p - wt.shape[0]), (0, cout_p - wt.shape[1])))
    return wt.astype(jnp.bfloat16)


# ------------------- the generalized fused conv kernel -----------------------

def _make_conv_kernel(*, kh, kw, tr, wo, cin_p, cin_s, has_pro, has_epi,
                      res_mode, has_rpro):
    def kernel(*refs):
        it = iter(refs)
        x_ref = next(it)
        w_ref = next(it)
        psc_ref = psh_ref = esc_ref = esh_ref = None
        res_ref = wsc_ref = rsc_ref = rsh_ref = None
        if has_pro:
            psc_ref, psh_ref = next(it), next(it)
        if has_epi:
            esc_ref, esh_ref = next(it), next(it)
        if res_mode == "add":
            res_ref = next(it)
        elif res_mode == "matmul":
            res_ref, wsc_ref = next(it), next(it)
            if has_rpro:
                rsc_ref, rsh_ref = next(it), next(it)
        o_ref = next(it)
        patch = next(it)                      # VMEM (tr*wo, kh*kw*cin_p) bf16

        r = pl.program_id(1)
        j = pl.program_id(2)
        hin, win = x_ref.shape[1], x_ref.shape[2]

        # Build the activated, border-correct kh*kw-tap patch matrix ONCE per
        # (batch, row-block); every cout tile (j) reuses it straight from VMEM.
        @pl.when(j == 0)
        def _build_patch():
            row0 = pl.multiple_of(r * tr, tr)
            rows = x_ref[0, pl.ds(row0, tr + kh - 1), :, :]    # (tr+kh-1, win, cin_p)
            if has_pro:                                        # fused BN1 + LeakyReLU
                y = rows.astype(jnp.float32) * psc_ref[...] + psh_ref[...]
                y = jnp.where(y >= 0.0, y, _NEG_SLOPE * y)
                # zero the 1-px spatially padded border (in-kernel mask replaces
                # the old "neutral border value" trick)
                col = jax.lax.broadcasted_iota(jnp.int32, (tr + kh - 1, win, 1), 1)
                row = jax.lax.broadcasted_iota(jnp.int32, (tr + kh - 1, win, 1), 0) + row0
                interior = ((col > 0) & (col < win - 1) &
                            (row > 0) & (row < hin - 1))
                a = jnp.where(interior, y, 0.0).astype(jnp.bfloat16)
            else:
                a = rows
            for dh in range(kh):
                for dw in range(kw):
                    t = dh * kw + dw
                    patch[:, t * cin_p:(t + 1) * cin_p] = (
                        a[dh:dh + tr, dw:dw + wo, :].reshape(tr * wo, cin_p))

        # One MXU dot with K = kh*kw*cin_p per cout tile.
        acc = jnp.dot(patch[...], w_ref[...], preferred_element_type=jnp.float32)

        if has_epi:                           # fused BN2 + LeakyReLU epilogue
            acc = acc * esc_ref[...] + esh_ref[...]
            acc = jnp.where(acc >= 0.0, acc, _NEG_SLOPE * acc)
        if res_mode == "add":                 # fused identity-shortcut add
            acc = acc + res_ref[0].reshape(tr * wo, acc.shape[-1]).astype(jnp.float32)
        elif res_mode == "matmul":            # fused 1x1-shortcut conv + add
            rs = res_ref[0].reshape(tr * wo, cin_s)
            if has_rpro:
                ry = rs.astype(jnp.float32) * rsc_ref[...] + rsh_ref[...]
                rs = jnp.where(ry >= 0.0, ry, _NEG_SLOPE * ry).astype(jnp.bfloat16)
            acc = acc + jnp.dot(rs, wsc_ref[...], preferred_element_type=jnp.float32)

        o_ref[0] = acc.reshape(tr, wo, acc.shape[-1]).astype(o_ref.dtype)
    return kernel


def _conv_vmem_bytes(hin, win, cin_p, k_total, tn, tr, wo, out_isz, res_bytes, kh):
    plane = hin * win * cin_p * 2
    w_blk = k_total * tn * 2
    out_blk = tr * wo * tn * out_isz
    patch = tr * wo * k_total * 2
    temps = (tr + kh) * win * cin_p * 4 + tr * wo * tn * 4
    return 2 * (plane + w_blk + out_blk + res_bytes) + patch + temps


def conv_taps(xp, w2d, *, kh, kw, ho, wo, prologue=None, epilogue=None,
              residual=None, shortcut=None, out_dtype=jnp.bfloat16):
    """Small-kernel stride-1 conv: out[b,i,j,:] = sum_{dh,dw} xp[b,i+dh,j+dw,:] @ W[dh,dw]
    with optional fused BN+LReLU prologue (incl. border mask) / epilogue, plus a
    fused residual add or fused 1x1-shortcut matmul.  xp already carries any
    spatial zero padding; w2d is tap-major (kh*kw*cin_p, cout_p)."""
    n, hin, win, cin_p = xp.shape
    k_total, cout_p = w2d.shape
    assert k_total == kh * kw * cin_p
    assert cin_p % _LANE == 0 and cout_p % _LANE == 0
    assert hin >= ho + kh - 1 and win >= wo + kw - 1
    assert wo % 8 == 0  # TODO(synk): masked stores for general (unaligned) widths
    if prologue is not None:
        assert kh == 3 and kw == 3  # border mask assumes 1-px symmetric padding

    tn = _pick_tile(cout_p, (256, 128))
    tr = _pick_tr(ho, wo, k_total)
    grid = (n, ho // tr, cout_p // tn)

    in_specs = [pl.BlockSpec((1, hin, win, cin_p), lambda b, r, j: (b, 0, 0, 0)),
                pl.BlockSpec((k_total, tn), lambda b, r, j: (0, j))]
    args = [xp, w2d]
    if prologue is not None:
        vs = pl.BlockSpec((1, cin_p), lambda b, r, j: (0, 0))
        in_specs += [vs, vs]
        args += [prologue[0].reshape(1, -1), prologue[1].reshape(1, -1)]
    if epilogue is not None:
        vs = pl.BlockSpec((1, tn), lambda b, r, j: (0, j))
        in_specs += [vs, vs]
        args += [epilogue[0].reshape(1, -1), epilogue[1].reshape(1, -1)]

    res_mode, has_rpro, cin_s, res_bytes, extra_flops = None, False, cin_p, 0, 0
    extra_bytes = 0
    if residual is not None:
        res_mode = "add"
        in_specs += [pl.BlockSpec((1, tr, wo, tn), lambda b, r, j: (b, r, 0, j))]
        args += [residual]
        res_bytes = tr * wo * tn * residual.dtype.itemsize
        extra_bytes = residual.size * residual.dtype.itemsize
    elif shortcut is not None:
        res_mode = "matmul"
        xs, wsc, rpro = shortcut
        cin_s = xs.shape[-1]
        in_specs += [pl.BlockSpec((1, tr, wo, cin_s), lambda b, r, j: (b, r, 0, 0)),
                     pl.BlockSpec((cin_s, tn), lambda b, r, j: (0, j))]
        args += [xs, wsc]
        res_bytes = tr * wo * cin_s * xs.dtype.itemsize + cin_s * tn * 2
        extra_flops = 2 * n * ho * wo * cin_s * cout_p
        extra_bytes = xs.size * 2 + wsc.size * 2
        if rpro is not None:
            has_rpro = True
            vs = pl.BlockSpec((1, cin_s), lambda b, r, j: (0, 0))
            in_specs += [vs, vs]
            args += [rpro[0].reshape(1, -1), rpro[1].reshape(1, -1)]

    out_spec = pl.BlockSpec((1, tr, wo, tn), lambda b, r, j: (b, r, 0, j))
    out_isz = jnp.dtype(out_dtype).itemsize

    kernel = _make_conv_kernel(kh=kh, kw=kw, tr=tr, wo=wo, cin_p=cin_p,
                               cin_s=cin_s, has_pro=prologue is not None,
                               has_epi=epilogue is not None, res_mode=res_mode,
                               has_rpro=has_rpro)

    work = _conv_vmem_bytes(hin, win, cin_p, k_total, tn, tr, wo, out_isz,
                            res_bytes, kh)
    flops = 2 * n * ho * wo * k_total * cout_p + extra_flops
    bytes_accessed = (xp.size * xp.dtype.itemsize              # plane resident per batch
                      + w2d.size * 2 * n * (ho // tr)          # refetched per row block
                      + n * ho * wo * cout_p * out_isz
                      + extra_bytes)

    return pl.pallas_call(
        kernel,
        out_shape=jax.ShapeDtypeStruct((n, ho, wo, cout_p), out_dtype),
        grid=grid,
        in_specs=in_specs,
        out_specs=out_spec,
        scratch_shapes=[pltpu.VMEM((tr * wo, k_total), jnp.bfloat16)],
        compiler_params=_compiler_params(("parallel", "parallel", "arbitrary"),
                                         work),
        cost_estimate=pl.CostEstimate(flops=int(flops), transcendentals=0,
                                      bytes_accessed=int(bytes_accessed)),
    )(*args)


# ------------------------------ forward pass ---------------------------------

def basic_block_forward(x_nchw, params, *, stride, activate_before_residual):
    """Reproduces BasicBlock.forward (inference mode)."""
    x = jnp.transpose(x_nchw, (0, 2, 3, 1)).astype(jnp.float32)        # NHWC f32
    n, h, w, cin = x.shape
    cout = params["conv1_w"].shape[0]
    equal_in_out = (cin == cout)
    if equal_in_out:
        # The reference module is only shape-consistent here for stride == 1.
        assert stride == 1, "equalInOut BasicBlock requires stride == 1"
    cin_p = _round_up(cin, _LANE)
    cout_p = _round_up(cout, _LANE)
    ho = (h + 2 - 3) // stride + 1
    wo = (w + 2 - 3) // stride + 1

    # Fold inference-mode BatchNorms into per-channel scale/shift.
    sc1, sh1 = fold_bn(params["bn1_gamma"], params["bn1_beta"],
                       params["bn1_mean"], params["bn1_var"])
    sc2, sh2 = fold_bn(params["bn2_gamma"], params["bn2_beta"],
                       params["bn2_mean"], params["bn2_var"])
    sc1p, sh1p = _pad_vec(sc1, cin_p, 1.0), _pad_vec(sh1, cin_p, 0.0)
    sc2p, sh2p = _pad_vec(sc2, cout_p, 1.0), _pad_vec(sh2, cout_p, 0.0)
    bn1_into_conv1 = equal_in_out or activate_before_residual

    a1 = None
    # --- conv1 (BN1/LReLU prologue + BN2/LReLU epilogue fused) ---
    if stride == 1:
        # single fused input-prep pass: transpose + spatial zero pad + channel
        # pad + bf16 cast
        xp1 = jnp.pad(x, ((0, 0), (1, 1), (1, 1), (0, cin_p - cin))
                      ).astype(jnp.bfloat16)
        w1 = _conv3x3_weight2d(params["conv1_w"], cin_p, cout_p)
        act2 = conv_taps(xp1, w1, kh=3, kw=3, ho=ho, wo=wo,
                         prologue=(sc1p, sh1p) if bn1_into_conv1 else None,
                         epilogue=(sc2p, sh2p), out_dtype=jnp.bfloat16)
    else:
        # strided conv1 via one-pass space-to-depth -> stride-1 2x2-tap conv
        # (the 9x im2col never touches HBM).
        # TODO(synk): general strides via in-kernel strided gather (pl.ds stride).
        assert stride == 2 and h % 2 == 0 and w % 2 == 0
        if bn1_into_conv1:
            t = x * sc1 + sh1
            a1 = jnp.where(t >= 0.0, t, _NEG_SLOPE * t)        # reused by shortcut
        else:
            a1 = x
        xp = jnp.pad(a1, ((0, 0), (1, 1), (1, 1), (0, 0)))
        hs, ws = (h + 2) // 2, (w + 2) // 2
        c4p = _round_up(4 * cin, _LANE)
        xs2d = (xp.reshape(n, hs, 2, ws, 2, cin)
                  .transpose(0, 1, 3, 2, 4, 5)
                  .reshape(n, hs, ws, 4 * cin))
        xs2d = jnp.pad(xs2d, ((0, 0), (0, 0), (0, 0), (0, c4p - 4 * cin))
                       ).astype(jnp.bfloat16)
        w1s = _conv3x3_weight_s2d(params["conv1_w"], c4p, cout_p)
        act2 = conv_taps(xs2d, w1s, kh=2, kw=2, ho=ho, wo=wo,
                         prologue=None, epilogue=(sc2p, sh2p),
                         out_dtype=jnp.bfloat16)

    # dropout == 0.0 -> identity (not emitted)

    # --- shortcut branch (fused into the conv2 kernel) ---
    residual, shortcut = None, None
    if equal_in_out:
        residual = jnp.pad(x, ((0, 0), (0, 0), (0, 0), (0, cout_p - cin))
                           ).astype(jnp.bfloat16)               # (n,ho,wo,cout_p)
    else:
        if stride == 1:
            xs = x
            rpro = (sc1p, sh1p) if activate_before_residual else None
        else:
            xs = (a1 if bn1_into_conv1 else x)[:, ::stride, ::stride, :]
            rpro = None
        xs = jnp.pad(xs, ((0, 0), (0, 0), (0, 0), (0, cin_p - cin))
                     ).astype(jnp.bfloat16)                      # (n,ho,wo,cin_p)
        wsc = _conv1x1_weight(params["convsc_w"], cin_p, cout_p)
        shortcut = (xs, wsc, rpro)

    # --- conv2 (3x3, stride 1) with fused residual / shortcut ---
    # TODO(synk): have conv1 emit a pre-padded plane to drop this pad pass too.
    xp2 = jnp.pad(act2, ((0, 0), (1, 1), (1, 1), (0, 0)))
    w2 = _conv3x3_weight2d(params["conv2_w"], cout_p, cout_p)
    y = conv_taps(xp2, w2, kh=3, kw=3, ho=ho, wo=wo,
                  prologue=None, epilogue=None,
                  residual=residual, shortcut=shortcut,
                  out_dtype=jnp.float32)

    y = y[..., :cout]
    return jnp.transpose(y, (0, 3, 1, 2))                        # back to NCHW


# --------------------------- pure-JAX reference -------------------------------

def reference_forward(x_nchw, params, *, stride, activate_before_residual):
    eps = 1e-5

    def bn(t, pre):
        g, b, m, v = (params[pre + "_gamma"], params[pre + "_beta"],
                      params[pre + "_mean"], params[pre + "_var"])
        inv = g / jnp.sqrt(v + eps)
        return (t * inv[None, :, None, None]
                + (b - m * inv)[None, :, None, None])

    def lrelu(t):
        return jnp.where(t >= 0, t, _NEG_SLOPE * t)

    def conv(t, wt, s, p):
        return jax.lax.conv_general_dilated(
            t, wt, (s, s), [(p, p), (p, p)],
            dimension_numbers=("NCHW", "OIHW", "NCHW"),
            precision=jax.lax.Precision.HIGHEST)

    x = x_nchw.astype(jnp.float32)
    cout, cin = params["conv1_w"].shape[0], params["conv1_w"].shape[1]
    equal = cin == cout
    act1 = lrelu(bn(x, "bn1"))
    if (not equal) and activate_before_residual:
        x = act1
    c1_in = act1 if equal else x
    out = lrelu(bn(conv(c1_in, params["conv1_w"], stride, 1), "bn2"))
    out = conv(out, params["conv2_w"], 1, 1)
    short = x if equal else conv(x, params["convsc_w"], stride, 0)
    return short + out


# ---------------------------- parameter init ---------------------------------

def init_params(key, in_planes, out_planes):
    ks = jax.random.split(key, 11)
    p = {
        "bn1_gamma": jax.random.uniform(ks[0], (in_planes,), jnp.float32, 0.5, 1.5),
        "bn1_beta":  0.1 * jax.random.normal(ks[1], (in_planes,), jnp.float32),
        "bn1_mean":  0.1 * jax.random.normal(ks[2], (in_planes,), jnp.float32),
        "bn1_var":   jax.random.uniform(ks[3], (in_planes,), jnp.float32, 0.5, 1.5),
        "conv1_w":   (jax.random.normal(ks[4], (out_planes, in_planes, 3, 3),
                                        jnp.float32) * (2.0 / (9 * in_planes)) ** 0.5),
        "bn2_gamma": jax.random.uniform(ks[5], (out_planes,), jnp.float32, 0.5, 1.5),
        "bn2_beta":  0.1 * jax.random.normal(ks[6], (out_planes,), jnp.float32),
        "bn2_mean":  0.1 * jax.random.normal(ks[7], (out_planes,), jnp.float32),
        "bn2_var":   jax.random.uniform(ks[8], (out_planes,), jnp.float32, 0.5, 1.5),
        "conv2_w":   (jax.random.normal(ks[9], (out_planes, out_planes, 3, 3),
                                        jnp.float32) * (2.0 / (9 * out_planes)) ** 0.5),
    }
    if in_planes != out_planes:
        p["convsc_w"] = (jax.random.normal(ks[10], (out_planes, in_planes, 1, 1),
                                           jnp.float32) * (2.0 / in_planes) ** 0.5)
    return p


# --------------------------------- main ---------------------------------------

if __name__ == "__main__":
    key = jax.random.PRNGKey(0)

    configs = [
        # (in_planes, out_planes, stride, activate_before_residual)
        (4, 8, 2, True),    # non-equal channels, strided, pre-activated shortcut
        (4, 4, 1, False),   # equal in/out, identity shortcut
    ]
    for idx, (cin, cout, stride, abr) in enumerate(configs):
        key, kx, kp = jax.random.split(key, 3)
        x = jax.random.normal(kx, (2, cin, 16, 16), jnp.float32)       # NCHW
        params = init_params(kp, cin, cout)

        fwd = jax.jit(functools.partial(basic_block_forward, stride=stride,
                                        activate_before_residual=abr))
        y = jax.block_until_ready(fwd(x, params))

        ho = (16 + 2 - 3) // stride + 1
        assert y.shape == (2, cout, ho, ho), (idx, y.shape)
        assert bool(jnp.all(jnp.isfinite(y)))

        y_ref = reference_forward(x, params, stride=stride,
                                  activate_before_residual=abr)
        err = float(jnp.max(jnp.abs(y - y_ref)))
        scale = float(jnp.max(jnp.abs(y_ref)))
        assert err <= 5e-2 * scale + 5e-2, (idx, err, scale)

    print("KERNEL_OK")
</pallas_src>

<mosaic_0001>
module attributes {stable_mosaic.version = 11 : i64} {
  func.func @kernel(%arg0: i32, %arg1: i32, %arg2: i32, %arg3: memref<1x9x9x128xbf16, #tpu.memory_space<vmem>>, %arg4: memref<512x128xbf16, #tpu.memory_space<vmem>>, %arg5: memref<1x128xf32, #tpu.memory_space<vmem>>, %arg6: memref<1x128xf32, #tpu.memory_space<vmem>>, %arg7: memref<1x8x8x128xbf16, #tpu.memory_space<vmem>>, %arg8: memref<64x512xbf16, #tpu.memory_space<vmem>>) attributes {dimension_semantics = [#tpu.dimension_semantics<parallel>, #tpu.dimension_semantics<parallel>, #tpu.dimension_semantics<arbitrary>], iteration_bounds = array<i64: 2, 1, 1>, scalar_prefetch = 0 : i64, scratch_operands = 1 : i64, tpu.core_type = #tpu.core_type<tc>, window_params = [{transform_indices = @transform_0, window_bounds = array<i64: 1, 9, 9, 128>}, {transform_indices = @transform_1, window_bounds = array<i64: 512, 128>}, {transform_indices = @transform_2, window_bounds = array<i64: 1, 128>}, {transform_indices = @transform_3, window_bounds = array<i64: 1, 128>}, {transform_indices = @transform_4, window_bounds = array<i64: 1, 8, 8, 128>}]} {
    %c0_i32 = arith.constant 0 : i32
    %0 = arith.cmpi eq, %arg2, %c0_i32 : i32
    %1 = arith.extui %0 : i1 to i32
    %c0_i32_0 = arith.constant 0 : i32
    %2 = arith.cmpi ne, %1, %c0_i32_0 : i32
    scf.if %2 {
      %c8_i32 = arith.constant 8 : i32
      %22 = arith.muli %arg1, %c8_i32 : i32
      %23 = tpu.assume_multiple %22, 8 : i32
      %c0_14 = arith.constant 0 : index
      %24 = arith.index_cast %23 : i32 to index
      %c0_15 = arith.constant 0 : index
      %c0_16 = arith.constant 0 : index
      %25 = vector.load %arg3[%c0_14, %24, %c0_15, %c0_16] : memref<1x9x9x128xbf16, #tpu.memory_space<vmem>>, vector<1x9x9x128xbf16>
      %26 = vector.shape_cast %25 : vector<1x9x9x128xbf16> to vector<9x9x128xbf16>
      %27 = vector.extract_strided_slice %26 {offsets = [0, 0, 0], sizes = [8, 8, 128], strides = [1, 1, 1]} : vector<9x9x128xbf16> to vector<8x8x128xbf16>
      %28 = vector.shape_cast %27 : vector<8x8x128xbf16> to vector<64x128xbf16>
      %c0_17 = arith.constant 0 : index
      %c0_18 = arith.constant 0 : index
      %29 = vector.load %arg8[%c0_17, %c0_18] : memref<64x512xbf16, #tpu.memory_space<vmem>>, vector<64x128xbf16>
      tpu.vector_store %arg8[%c0_17, %c0_18], %28 {strides = array<i32>} : memref<64x512xbf16, #tpu.memory_space<vmem>>, vector<64x128xbf16>,
      %30 = vector.extract_strided_slice %26 {offsets = [0, 1, 0], sizes = [8, 8, 128], strides = [1, 1, 1]} : vector<9x9x128xbf16> to vector<8x8x128xbf16>
      %31 = vector.shape_cast %30 : vector<8x8x128xbf16> to vector<64x128xbf16>
      %c0_19 = arith.constant 0 : index
      %c128 = arith.constant 128 : index
      %32 = vector.load %arg8[%c0_19, %c128] : memref<64x512xbf16, #tpu.memory_space<vmem>>, vector<64x128xbf16>
      tpu.vector_store %arg8[%c0_19, %c128], %31 {strides = array<i32>} : memref<64x512xbf16, #tpu.memory_space<vmem>>, vector<64x128xbf16>,
      %33 = vector.extract_strided_slice %26 {offsets = [1, 0, 0], sizes = [8, 8, 128], strides = [1, 1, 1]} : vector<9x9x128xbf16> to vector<8x8x128xbf16>
      %34 = vector.shape_cast %33 : vector<8x8x128xbf16> to vector<64x128xbf16>
      %c0_20 = arith.constant 0 : index
      %c256 = arith.constant 256 : index
      %35 = vector.load %arg8[%c0_20, %c256] : memref<64x512xbf16, #tpu.memory_space<vmem>>, vector<64x128xbf16>
      tpu.vector_store %arg8[%c0_20, %c256], %34 {strides = array<i32>} : memref<64x512xbf16, #tpu.memory_space<vmem>>, vector<64x128xbf16>,
      %36 = vector.extract_strided_slice %26 {offsets = [1, 1, 0], sizes = [8, 8, 128], strides = [1, 1, 1]} : vector<9x9x128xbf16> to vector<8x8x128xbf16>
      %37 = vector.shape_cast %36 : vector<8x8x128xbf16> to vector<64x128xbf16>
      %c0_21 = arith.constant 0 : index
      %c384 = arith.constant 384 : index
      %38 = vector.load %arg8[%c0_21, %c384] : memref<64x512xbf16, #tpu.memory_space<vmem>>, vector<64x128xbf16>
      tpu.vector_store %arg8[%c0_21, %c384], %37 {strides = array<i32>} : memref<64x512xbf16, #tpu.memory_space<vmem>>, vector<64x128xbf16>,
    } else {
    }
    %c0 = arith.constant 0 : index
    %c0_1 = arith.constant 0 : index
    %3 = vector.load %arg8[%c0, %c0_1] : memref<64x512xbf16, #tpu.memory_space<vmem>>, vector<64x512xbf16>
    %c0_2 = arith.constant 0 : index
    %c0_3 = arith.constant 0 : index
    %4 = vector.load %arg4[%c0_2, %c0_3] : memref<512x128xbf16, #tpu.memory_space<vmem>>, vector<512x128xbf16>
    %cst = arith.constant dense<0.000000e+00> : vector<64x128xf32>
    %5 = tpu.matmul %3, %4, %cst {dimension_numbers = #tpu.dot_dimension_numbers<[1], [0], [0], [1], [0, 0, 1, 1], [], []>} : vector<64x512xbf16>, vector<512x128xbf16>, vector<64x128xf32> -> vector<64x128xf32>
    %c0_4 = arith.constant 0 : index
    %c0_5 = arith.constant 0 : index
    %6 = vector.load %arg5[%c0_4, %c0_5] : memref<1x128xf32, #tpu.memory_space<vmem>>, vector<1x128xf32>
    %7 = vector.broadcast %6 : vector<1x128xf32> to vector<64x128xf32>
    %8 = arith.mulf %5, %7 : vector<64x128xf32>
    %c0_6 = arith.constant 0 : index
    %c0_7 = arith.constant 0 : index
    %9 = vector.load %arg6[%c0_6, %c0_7] : memref<1x128xf32, #tpu.memory_space<vmem>>, vector<1x128xf32>
    %10 = vector.broadcast %9 : vector<1x128xf32> to vector<64x128xf32>
    %11 = arith.addf %8, %10 : vector<64x128xf32>
    %cst_8 = arith.constant 0.000000e+00 : f32
    %12 = vector.broadcast %cst_8 : f32 to vector<64x128xf32>
    %13 = arith.cmpf oge, %11, %12 : vector<64x128xf32>
    %cst_9 = arith.constant 1.000000e-01 : f32
    %14 = vector.broadcast %cst_9 : f32 to vector<64x128xf32>
    %15 = arith.mulf %14, %11 : vector<64x128xf32>
    %16 = arith.select %13, %11, %15 : vector<64x128xi1>, vector<64x128xf32>
    %17 = vector.shape_cast %16 : vector<64x128xf32> to vector<8x8x128xf32>
    %18 = arith.truncf %17 : vector<8x8x128xf32> to vector<8x8x128xbf16>
    %c0_10 = arith.constant 0 : index
    %c0_11 = arith.constant 0 : index
    %c0_12 = arith.constant 0 : index
    %c0_13 = arith.constant 0 : index
    %19 = vector.load %arg7[%c0_10, %c0_11, %c0_12, %c0_13] : memref<1x8x8x128xbf16, #tpu.memory_space<vmem>>, vector<1x8x8x128xbf16>
    %20 = vector.shape_cast %19 : vector<1x8x8x128xbf16> to vector<8x8x128xbf16>
    %21 = vector.shape_cast %18 : vector<8x8x128xbf16> to vector<1x8x8x128xbf16>
    tpu.vector_store %arg7[%c0_10, %c0_11, %c0_12, %c0_13], %21 {strides = array<i32>} : memref<1x8x8x128xbf16, #tpu.memory_space<vmem>>, vector<1x8x8x128xbf16>,
    return
  }
  func.func @transform_0(%arg0: i32, %arg1: i32, %arg2: i32) -> (i32, i32, i32, i32) {
    %c0_i32 = arith.constant 0 : i32
    %c0_i32_0 = arith.constant 0 : i32
    %c0_i32_1 = arith.constant 0 : i32
    %c0_i32_2 = arith.constant 0 : i32
    return %arg0, %c0_i32, %c0_i32_0, %c0_i32_1 : i32, i32, i32, i32
  }
  func.func @transform_1(%arg0: i32, %arg1: i32, %arg2: i32) -> (i32, i32) {
    %c0_i32 = arith.constant 0 : i32
    %c0_i32_0 = arith.constant 0 : i32
    return %c0_i32, %arg2 : i32, i32
  }
  func.func @transform_2(%arg0: i32, %arg1: i32, %arg2: i32) -> (i32, i32) {
    %c0_i32 = arith.constant 0 : i32
    %c0_i32_0 = arith.constant 0 : i32
    return %c0_i32, %arg2 : i32, i32
  }
  func.func @transform_3(%arg0: i32, %arg1: i32, %arg2: i32) -> (i32, i32) {
    %c0_i32 = arith.constant 0 : i32
    %c0_i32_0 = arith.constant 0 : i32
    return %c0_i32, %arg2 : i32, i32
  }
  func.func @transform_4(%arg0: i32, %arg1: i32, %arg2: i32) -> (i32, i32, i32, i32) {
    %c0_i32 = arith.constant 0 : i32
    %c0_i32_0 = arith.constant 0 : i32
    return %arg0, %arg1, %c0_i32, %arg2 : i32, i32, i32, i32
  }
}

module attributes {stable_mosaic.version = 11 : i64} {
  func.func @kernel(%arg0: i32, %arg1: i32, %arg2: i32, %arg3: memref<1x10x10x128xbf16, #tpu.memory_space<vmem>>, %arg4: memref<1152x128xbf16, #tpu.memory_space<vmem>>, %arg5: memref<1x8x8x128xbf16, #tpu.memory_space<vmem>>, %arg6: memref<128x128xbf16, #tpu.memory_space<vmem>>, %arg7: memref<1x8x8x128xf32, #tpu.memory_space<vmem>>, %arg8: memref<64x1152xbf16, #tpu.memory_space<vmem>>) attributes {dimension_semantics = [#tpu.dimension_semantics<parallel>, #tpu.dimension_semantics<parallel>, #tpu.dimension_semantics<arbitrary>], iteration_bounds = array<i64: 2, 1, 1>, scalar_prefetch = 0 : i64, scratch_operands = 1 : i64, tpu.core_type = #tpu.core_type<tc>, window_params = [{transform_indices = @transform_0, window_bounds = array<i64: 1, 10, 10, 128>}, {transform_indices = @transform_1, window_bounds = array<i64: 1152, 128>}, {transform_indices = @transform_2, window_bounds = array<i64: 1, 8, 8, 128>}, {transform_indices = @transform_3, window_bounds = array<i64: 128, 128>}, {transform_indices = @transform_4, window_bounds = array<i64: 1, 8, 8, 128>}]} {
    %c0_i32 = arith.constant 0 : i32
    %0 = arith.cmpi eq, %arg2, %c0_i32 : i32
    %1 = arith.extui %0 : i1 to i32
    %c0_i32_0 = arith.constant 0 : i32
    %2 = arith.cmpi ne, %1, %c0_i32_0 : i32
    scf.if %2 {
      %c8_i32 = arith.constant 8 : i32
      %16 = arith.muli %arg1, %c8_i32 : i32
      %17 = tpu.assume_multiple %16, 8 : i32
      %c0_15 = arith.constant 0 : index
      %18 = arith.index_cast %17 : i32 to index
      %c0_16 = arith.constant 0 : index
      %c0_17 = arith.constant 0 : index
      %19 = vector.load %arg3[%c0_15, %18, %c0_16, %c0_17] : memref<1x10x10x128xbf16, #tpu.memory_space<vmem>>, vector<1x10x10x128xbf16>
      %20 = vector.shape_cast %19 : vector<1x10x10x128xbf16> to vector<10x10x128xbf16>
      %21 = vector.extract_strided_slice %20 {offsets = [0, 0, 0], sizes = [8, 8, 128], strides = [1, 1, 1]} : vector<10x10x128xbf16> to vector<8x8x128xbf16>
      %22 = vector.shape_cast %21 : vector<8x8x128xbf16> to vector<64x128xbf16>
      %c0_18 = arith.constant 0 : index
      %c0_19 = arith.constant 0 : index
      %23 = vector.load %arg8[%c0_18, %c0_19] : memref<64x1152xbf16, #tpu.memory_space<vmem>>, vector<64x128xbf16>
      tpu.vector_store %arg8[%c0_18, %c0_19], %22 {strides = array<i32>} : memref<64x1152xbf16, #tpu.memory_space<vmem>>, vector<64x128xbf16>,
      %24 = vector.extract_strided_slice %20 {offsets = [0, 1, 0], sizes = [8, 8, 128], strides = [1, 1, 1]} : vector<10x10x128xbf16> to vector<8x8x128xbf16>
      %25 = vector.shape_cast %24 : vector<8x8x128xbf16> to vector<64x128xbf16>
      %c0_20 = arith.constant 0 : index
      %c128 = arith.constant 128 : index
      %26 = vector.load %arg8[%c0_20, %c128] : memref<64x1152xbf16, #tpu.memory_space<vmem>>, vector<64x128xbf16>
      tpu.vector_store %arg8[%c0_20, %c128], %25 {strides = array<i32>} : memref<64x1152xbf16, #tpu.memory_space<vmem>>, vector<64x128xbf16>,
      %27 = vector.extract_strided_slice %20 {offsets = [0, 2, 0], sizes = [8, 8, 128], strides = [1, 1, 1]} : vector<10x10x128xbf16> to vector<8x8x128xbf16>
      %28 = vector.shape_cast %27 : vector<8x8x128xbf16> to vector<64x128xbf16>
      %c0_21 = arith.constant 0 : index
      %c256 = arith.constant 256 : index
      %29 = vector.load %arg8[%c0_21, %c256] : memref<64x1152xbf16, #tpu.memory_space<vmem>>, vector<64x128xbf16>
      tpu.vector_store %arg8[%c0_21, %c256], %28 {strides = array<i32>} : memref<64x1152xbf16, #tpu.memory_space<vmem>>, vector<64x128xbf16>,
      %30 = vector.extract_strided_slice %20 {offsets = [1, 0, 0], sizes = [8, 8, 128], strides = [1, 1, 1]} : vector<10x10x128xbf16> to vector<8x8x128xbf16>
      %31 = vector.shape_cast %30 : vector<8x8x128xbf16> to vector<64x128xbf16>
      %c0_22 = arith.constant 0 : index
      %c384 = arith.constant 384 : index
      %32 = vector.load %arg8[%c0_22, %c384] : memref<64x1152xbf16, #tpu.memory_space<vmem>>, vector<64x128xbf16>
      tpu.vector_store %arg8[%c0_22, %c384], %31 {strides = array<i32>} : memref<64x1152xbf16, #tpu.memory_space<vmem>>, vector<64x128xbf16>,
      %33 = vector.extract_strided_slice %20 {offsets = [1, 1, 0], sizes = [8, 8, 128], strides = [1, 1, 1]} : vector<10x10x128xbf16> to vector<8x8x128xbf16>
      %34 = vector.shape_cast %33 : vector<8x8x128xbf16> to vector<64x128xbf16>
      %c0_23 = arith.constant 0 : index
      %c512 = arith.constant 512 : index
      %35 = vector.load %arg8[%c0_23, %c512] : memref<64x1152xbf16, #tpu.memory_space<vmem>>, vector<64x128xbf16>
      tpu.vector_store %arg8[%c0_23, %c512], %34 {strides = array<i32>} : memref<64x1152xbf16, #tpu.memory_space<vmem>>, vector<64x128xbf16>,
      %36 = vector.extract_strided_slice %20 {offsets = [1, 2, 0], sizes = [8, 8, 128], strides = [1, 1, 1]} : vector<10x10x128xbf16> to vector<8x8x128xbf16>
      %37 = vector.shape_cast %36 : vector<8x8x128xbf16> to vector<64x128xbf16>
      %c0_24 = arith.constant 0 : index
      %c640 = arith.constant 640 : index
      %38 = vector.load %arg8[%c0_24, %c640] : memref<64x1152xbf16, #tpu.memory_space<vmem>>, vector<64x128xbf16>
      tpu.vector_store %arg8[%c0_24, %c640], %37 {strides = array<i32>} : memref<64x1152xbf16, #tpu.memory_space<vmem>>, vector<64x128xbf16>,
      %39 = vector.extract_strided_slice %20 {offsets = [2, 0, 0], sizes = [8, 8, 128], strides = [1, 1, 1]} : vector<10x10x128xbf16> to vector<8x8x128xbf16>
      %40 = vector.shape_cast %39 : vector<8x8x128xbf16> to vector<64x128xbf16>
      %c0_25 = arith.constant 0 : index
      %c768 = arith.constant 768 : index
      %41 = vector.load %arg8[%c0_25, %c768] : memref<64x1152xbf16, #tpu.memory_space<vmem>>, vector<64x128xbf16>
      tpu.vector_store %arg8[%c0_25, %c768], %40 {strides = array<i32>} : memref<64x1152xbf16, #tpu.memory_space<vmem>>, vector<64x128xbf16>,
      %42 = vector.extract_strided_slice %20 {offsets = [2, 1, 0], sizes = [8, 8, 128], strides = [1, 1, 1]} : vector<10x10x128xbf16> to vector<8x8x128xbf16>
      %43 = vector.shape_cast %42 : vector<8x8x128xbf16> to vector<64x128xbf16>
      %c0_26 = arith.constant 0 : index
      %c896 = arith.constant 896 : index
      %44 = vector.load %arg8[%c0_26, %c896] : memref<64x1152xbf16, #tpu.memory_space<vmem>>, vector<64x128xbf16>
      tpu.vector_store %arg8[%c0_26, %c896], %43 {strides = array<i32>} : memref<64x1152xbf16, #tpu.memory_space<vmem>>, vector<64x128xbf16>,
      %45 = vector.extract_strided_slice %20 {offsets = [2, 2, 0], sizes = [8, 8, 128], strides = [1, 1, 1]} : vector<10x10x128xbf16> to vector<8x8x128xbf16>
      %46 = vector.shape_cast %45 : vector<8x8x128xbf16> to vector<64x128xbf16>
      %c0_27 = arith.constant 0 : index
      %c1024 = arith.constant 1024 : index
      %47 = vector.load %arg8[%c0_27, %c1024] : memref<64x1152xbf16, #tpu.memory_space<vmem>>, vector<64x128xbf16>
      tpu.vector_store %arg8[%c0_27, %c1024], %46 {strides = array<i32>} : memref<64x1152xbf16, #tpu.memory_space<vmem>>, vector<64x128xbf16>,
    } else {
    }
    %c0 = arith.constant 0 : index
    %c0_1 = arith.constant 0 : index
    %3 = vector.load %arg8[%c0, %c0_1] : memref<64x1152xbf16, #tpu.memory_space<vmem>>, vector<64x1152xbf16>
    %c0_2 = arith.constant 0 : index
    %c0_3 = arith.constant 0 : index
    %4 = vector.load %arg4[%c0_2, %c0_3] : memref<1152x128xbf16, #tpu.memory_space<vmem>>, vector<1152x128xbf16>
    %cst = arith.constant dense<0.000000e+00> : vector<64x128xf32>
    %5 = tpu.matmul %3, %4, %cst {dimension_numbers = #tpu.dot_dimension_numbers<[1], [0], [0], [1], [0, 0, 1, 1], [], []>} : vector<64x1152xbf16>, vector<1152x128xbf16>, vector<64x128xf32> -> vector<64x128xf32>
    %c0_4 = arith.constant 0 : index
    %c0_5 = arith.constant 0 : index
    %c0_6 = arith.constant 0 : index
    %c0_7 = arith.constant 0 : index
    %6 = vector.load %arg5[%c0_4, %c0_5, %c0_6, %c0_7] : memref<1x8x8x128xbf16, #tpu.memory_space<vmem>>, vector<1x8x8x128xbf16>
    %7 = vector.shape_cast %6 : vector<1x8x8x128xbf16> to vector<8x8x128xbf16>
    %8 = vector.shape_cast %7 : vector<8x8x128xbf16> to vector<64x128xbf16>
    %c0_8 = arith.constant 0 : index
    %c0_9 = arith.constant 0 : index
    %9 = vector.load %arg6[%c0_8, %c0_9] : memref<128x128xbf16, #tpu.memory_space<vmem>>, vector<128x128xbf16>
    %cst_10 = arith.constant dense<0.000000e+00> : vector<64x128xf32>
    %10 = tpu.matmul %8, %9, %cst_10 {dimension_numbers = #tpu.dot_dimension_numbers<[1], [0], [0], [1], [0, 0, 1, 1], [], []>} : vector<64x128xbf16>, vector<128x128xbf16>, vector<64x128xf32> -> vector<64x128xf32>
    %11 = arith.addf %5, %10 : vector<64x128xf32>
    %12 = vector.shape_cast %11 : vector<64x128xf32> to vector<8x8x128xf32>
    %c0_11 = arith.constant 0 : index
    %c0_12 = arith.constant 0 : index
    %c0_13 = arith.constant 0 : index
    %c0_14 = arith.constant 0 : index
    %13 = vector.load %arg7[%c0_11, %c0_12, %c0_13, %c0_14] : memref<1x8x8x128xf32, #tpu.memory_space<vmem>>, vector<1x8x8x128xf32>
    %14 = vector.shape_cast %13 : vector<1x8x8x128xf32> to vector<8x8x128xf32>
    %15 = vector.shape_cast %12 : vector<8x8x128xf32> to vector<1x8x8x128xf32>
    tpu.vector_store %arg7[%c0_11, %c0_12, %c0_13, %c0_14], %15 {strides = array<i32>} : memref<1x8x8x128xf32, #tpu.memory_space<vmem>>, vector<1x8x8x128xf32>,
    return
  }
  func.func @transform_0(%arg0: i32, %arg1: i32, %arg2: i32) -> (i32, i32, i32, i32) {
    %c0_i32 = arith.constant 0 : i32
    %c0_i32_0 = arith.constant 0 : i32
    %c0_i32_1 = arith.constant 0 : i32
    %c0_i32_2 = arith.constant 0 : i32
    return %arg0, %c0_i32, %c0_i32_0, %c0_i32_1 : i32, i32, i32, i32
  }
  func.func @transform_1(%arg0: i32, %arg1: i32, %arg2: i32) -> (i32, i32) {
    %c0_i32 = arith.constant 0 : i32
    %c0_i32_0 = arith.constant 0 : i32
    return %c0_i32, %arg2 : i32, i32
  }
  func.func @transform_2(%arg0: i32, %arg1: i32, %arg2: i32) -> (i32, i32, i32, i32) {
    %c0_i32 = arith.constant 0 : i32
    %c0_i32_0 = arith.constant 0 : i32
    %c0_i32_1 = arith.constant 0 : i32
    return %arg0, %arg1, %c0_i32, %c0_i32_0 : i32, i32, i32, i32
  }
  func.func @transform_3(%arg0: i32, %arg1: i32, %arg2: i32) -> (i32, i32) {
    %c0_i32 = arith.constant 0 : i32
    %c0_i32_0 = arith.constant 0 : i32
    return %c0_i32, %arg2 : i32, i32
  }
  func.func @transform_4(%arg0: i32, %arg1: i32, %arg2: i32) -> (i32, i32, i32, i32) {
    %c0_i32 = arith.constant 0 : i32
    %c0_i32_0 = arith.constant 0 : i32
    return %arg0, %arg1, %c0_i32, %arg2 : i32, i32, i32, i32
  }
}

</mosaic_0001>

<bundles_post_ra>
// kernel: basic_block_forward.2
= control target key start
LH: loop header
LB: loop body
LE: loop exit
PB: predicated region body
PF: predicated region fallthrough
CT: control target
= control target key end

     0   :  { %s1497_s15 = smov 0   ;;  %s1499_s16 = smov 0   ;;  %s1706_s0 = inlined_call_operand.vmem [shape: bf16[2,9,9,128], index: 0, kind: input, shape index: {}]   ;;  %s1707_s1 = inlined_call_operand.vmem [shape: bf16[512,128], index: 1, kind: input, shape index: {}]   ;;  %s1708_s2 = inlined_call_operand.vmem [shape: f32[1,128], index: 2, kind: input, shape index: {}]   ;;  %s1709_s3 = inlined_call_operand.vmem [shape: f32[1,128], index: 3, kind: input, shape index: {}]   ;;  %s1710_s4 = inlined_call_operand.vmem [shape: bf16[2,8,8,128], index: 4, kind: output, shape index: {}]  }
   0x1   :  { %s1501_s17 = smov 0  }
   0x2 LB: > { %s33_s18 = sadd.s32 1, %s1466_s16  ;;  %p1151_p0 = scmp.ge.s32.totalorder %s1470_s17, 1  ;;  %s1470_s17 = sphi %s1501_s17, %s14_s17   ;;  %s1466_s16 = sphi %s1499_s16, %s1714_s16   ;;  %s1462_s15 = sphi %s1497_s15, %s1713_s15  }
   0x3   : > { %p35_p1 = scmp.ge.s32.totalorder %s33_s18, 2  ;;  %p210_p2 = scmp.lt.s32.totalorder %s1470_s17, 3 }
   0x5   : > { %s1716_s18 = smov (%p35_p1, %s33_s18), 0  ;;  %p211_p3 = pnand %p1151_p0, %p210_p2 }
   0x6   : > { %p253_p4 = scmp.lt.s32.totalorder (!%p211_p3), %s1462_s15, 1 }
   0x7   : > { %214 = sbr.rel (%p211_p3) target bundleno = 248 (0xf8), region = 36 }
   0xc   : > { %v1373_v0 = vld [vmem:[%s1707_s1 + $0x38] sm:$0xff]  ;;  %v1372_v4 = vld [vmem:[%s1707_s1 + $0x30] sm:$0xff]  ;;  %s1718_s15 = smov (!%p253_p4, %s1462_s15), 1  ;;  %v1371_v8 = vld [vmem:[%s1707_s1 + $0x28] sm:$0xff]  ;;  %vm315_vm0 = vsmask.f32 3328 }
   0xd   : > { %v1381_v1 = vld [vmem:[%s1707_s1 + $0x78] sm:$0xff]  ;;  %829 = vmatpush.bf16.msra.mxu0 %v1373_v0  ;;  %v1380_v5 = vld [vmem:[%s1707_s1 + $0x70] sm:$0xff]  ;;  %s1421_s9 = smul.u32 72, %s1718_s15  ;;  %v1379_v9 = vld [vmem:[%s1707_s1 + $0x68] sm:$0xff]  ;;  %vm316_vm1 = vsmask.f32 7440 }
   0xe   : > { %v1389_v2 = vld [vmem:[%s1707_s1 + $0xb8] sm:$0xff]  ;;  %858 = vmatpush.bf16.msra.mxu1 %v1381_v1  ;;  %v1388_v6 = vld [vmem:[%s1707_s1 + $0xb0] sm:$0xff]  ;;  %v1387_v10 = vld [vmem:[%s1707_s1 + $0xa8] sm:$0xff]  ;;  %s1349_s26 = sshll.u32 %s1718_s15, 5 }
   0xf   : > { %v1397_v3 = vld [vmem:[%s1707_s1 + $0xf8] sm:$0xff]  ;;  %887 = vmatpush.bf16.msra.mxu2 %v1389_v2  ;;  %v1396_v7 = vld [vmem:[%s1707_s1 + $0xf0] sm:$0xff]  ;;  %v1395_v11 = vld [vmem:[%s1707_s1 + $0xe8] sm:$0xff]  ;;  %s1557_s24 = scalar_lea.vmem %s1706_s0, %s1421_s9  ;;  %s1679_s29 = scalar_lea.vmem %s1710_s4, %s1349_s26 }
  0x10   : > { %916 = vmatpush.bf16.msra.mxu3 %v1397_v3  ;;  %v1370_v12 = vld [vmem:[%s1707_s1 + $0x20] sm:$0xff]  ;;  %v291_v17 = vld [vmem:[%s1557_s24 + $0x8] sm:$0xf]  ;;  %v1369_v20 = vld [vmem:[%s1707_s1 + $0x18] sm:$0xff] }
  0x11   : > { %830 = vmatpush.bf16.msra.mxu0 %v1372_v4  ;;  %v1378_v13 = vld [vmem:[%s1707_s1 + $0x60] sm:$0xff]  ;;  %v1377_v21 = vld [vmem:[%s1707_s1 + $0x58] sm:$0xff]  ;;  %308 = vst [vmem:[#allocation2 + $0x10] sm:$0xf] %v291_v17  ;;  %v333_v22 = vshrl.u32 %v291_v17, 16  ;;  %v336_v23 = vshll.u32 %v291_v17, 16  ;;  %vm1591_vm2 = vmor %vm315_vm0, %vm316_vm1 }
  0x12   : > { %859 = vmatpush.bf16.msra.mxu1 %v1380_v5  ;;  %v1386_v14 = vld [vmem:[%s1707_s1 + $0xa0] sm:$0xff]  ;;  %v1385_v25 = vld [vmem:[%s1707_s1 + $0x98] sm:$0xff]  ;;  %446 = vst [vmem:[#allocation2 + $0x8] sm:$0xf] %v291_v17  ;;  %v292_v29 = vld [vmem:[%s1557_s24 + $0xc] sm:$0x1] }
  0x13   : > { %888 = vmatpush.bf16.msra.mxu2 %v1388_v6  ;;  %v1394_v15 = vld [vmem:[%s1707_s1 + $0xe0] sm:$0xff]  ;;  %v1393_v26 = vld [vmem:[%s1707_s1 + $0xd8] sm:$0xff]  ;;  %v335_v31 = vrot.slane %v333_v22, 4  ;;  %v338_v32 = vrot.slane %v336_v23, 5  ;;  %v342_v33 = vshll.u32 %v292_v29, 16  ;;  %v1368_v48 = vld [vmem:[%s1707_s1 + $0x10] sm:$0xff] }
  0x14   : > { %917 = vmatpush.bf16.msra.mxu3 %v1396_v7  ;;  %v289_v16 = vld [vmem:[%s1557_s24] sm:$0xf]  ;;  %v290_v24 = vld [vmem:[%s1557_s24 + $0x4] sm:$0x1]  ;;  %v293_v34 = vld [vmem:[%s1557_s24 + $0x10] sm:$0xf] }
  0x15   : > { %831 = vmatpush.bf16.msra.mxu0 %v1371_v8  ;;  %307 = vst [vmem:[#allocation2] sm:$0xf] %v289_v16  ;;  %v319_v18 = vshrl.u32 %v289_v16, 16  ;;  %v322_v19 = vshll.u32 %v289_v16, 16  ;;  %v328_v30 = vshll.u32 %v290_v24, 16  ;;  %v347_v36 = vshrl.u32 %v293_v34, 16 }
  0x16   : > { %860 = vmatpush.bf16.msra.mxu1 %v1379_v9  ;;  %v350_v37 = vshll.u32 %v293_v34, 16  ;;  %447 = vst [vmem:[#allocation2 + $0x18] sm:$0xf] %v293_v34  ;;  %v294_v38 = vld [vmem:[%s1557_s24 + $0x14] sm:$0x1]  ;;  %v339_v41 = vor.u32 %v338_v32, %v335_v31  ;;  %v344_v42 = vrot.slane %v342_v33, 5 }
  0x17   : > { %889 = vmatpush.bf16.msra.mxu2 %v1387_v10  ;;  %v321_v27 = vrot.slane %v319_v18, 4  ;;  %v324_v28 = vrot.slane %v322_v19, 5  ;;  %v330_v40 = vrot.slane %v328_v30, 5  ;;  %309 = vst [vmem:[#allocation2 + $0x20] sm:$0xf] %v293_v34  ;;  %v356_v43 = vshll.u32 %v294_v38, 16 }
  0x18   : > { %918 = vmatpush.bf16.msra.mxu3 %v1395_v11  ;;  %v349_v45 = vrot.slane %v347_v36, 4  ;;  %v352_v46 = vrot.slane %v350_v37, 5  ;;  %v295_v47 = vld [vmem:[%s1557_s24 + $0x18] sm:$0xf]  ;;  %v1376_v49 = vld [vmem:[%s1707_s1 + $0x50] sm:$0xff]  ;;  %v340_v50 = vrot.slane %v339_v41, 4 }
  0x19   : > { %832 = vmatpush.bf16.msra.mxu0 %v1370_v12  ;;  %v325_v35 = vor.u32 %v324_v28, %v321_v27  ;;  %v358_v51 = vrot.slane %v356_v43, 5  ;;  %310 = vst [vmem:[#allocation2 + $0x30] sm:$0xf] %v295_v47  ;;  %v1384_v52 = vld [vmem:[%s1707_s1 + $0x90] sm:$0xff]  ;;  %v361_v56 = vshrl.u32 %v295_v47, 16  ;;  %v364_v57 = vshll.u32 %v295_v47, 16 }
  0x1a   : > { %861 = vmatpush.bf16.msra.mxu1 %v1378_v13  ;;  %v1392_v53 = vld [vmem:[%s1707_s1 + $0xd0] sm:$0xff]  ;;  %v353_v55 = vor.u32 %v352_v46, %v349_v45  ;;  %448 = vst [vmem:[#allocation2 + $0x28] sm:$0xf] %v295_v47  ;;  %v345_v58 = vsel %vm1591_vm2, %v340_v50, %v344_v42  ;;  %v296_v59 = vld [vmem:[%s1557_s24 + $0x1c] sm:$0x1]  ;;  %v1367_v0 = vld [vmem:[%s1707_s1 + $0x8] sm:$0xff] }
  0x1b   : > { %890 = vmatpush.bf16.msra.mxu2 %v1386_v14  ;;  %v326_v44 = vrot.slane %v325_v35, 4  ;;  %439 = vst [vmem:[#allocation2 + $0x14] sm:$0xf] %v345_v58  ;;  %v363_v61 = vrot.slane %v361_v56, 4  ;;  %v366_v62 = vrot.slane %v364_v57, 5  ;;  %v370_v63 = vshll.u32 %v296_v59, 16 }
  0x1c   : > { %919 = vmatpush.bf16.msra.mxu3 %v1394_v15  ;;  %v354_v60 = vrot.slane %v353_v55, 4  ;;  %v1375_v1 = vld [vmem:[%s1707_s1 + $0x48] sm:$0xff]  ;;  %469 = vst [vmem:[#allocation2 + $0xc] sm:$0xf] %v345_v58  ;;  %v297_v2 = vld [vmem:[%s1557_s24 + $0x20] sm:$0xf] }
  0x1d   : > { %833 = vmatpush.bf16.msra.mxu0 %v1369_v20  ;;  %v331_v54 = vsel %vm1591_vm2, %v326_v44, %v330_v40  ;;  %v1383_v3 = vld [vmem:[%s1707_s1 + $0x88] sm:$0xff]  ;;  %v367_v6 = vor.u32 %v366_v62, %v363_v61  ;;  %v372_v7 = vrot.slane %v370_v63, 5  ;;  %v298_v8 = vld [vmem:[%s1557_s24 + $0x24] sm:$0x1]  ;;  %v1157_v11 = vld [vmem:[#allocation2] sm:$0xf] }
  0x1e   : > { %862 = vmatpush.bf16.msra.mxu1 %v1377_v21  ;;  %438 = vst [vmem:[#allocation2 + $0x4] sm:$0xf] %v331_v54  ;;  %v1391_v4 = vld [vmem:[%s1707_s1 + $0xc8] sm:$0xff]  ;;  %v359_v5 = vsel %vm1591_vm2, %v354_v60, %v358_v51  ;;  %v1366_v9 = vld [vmem:[%s1707_s1] sm:$0xff]  ;;  %v1352_v12 = vld [vmem:[#allocation2 + $0xc] sm:$0xf0] }
  0x1f   : > { %891 = vmatpush.bf16.msra.mxu2 %v1385_v25  ;;  %v1374_v10 = vld [vmem:[%s1707_s1 + $0x40] sm:$0xff]  ;;  %470 = vst [vmem:[#allocation2 + $0x1c] sm:$0xf] %v359_v5  ;;  %v375_v13 = vshrl.u32 %v297_v2, 16  ;;  %v378_v14 = vshll.u32 %v297_v2, 16  ;;  %v384_v15 = vshll.u32 %v298_v8, 16  ;;  %v1158_v29 = vor.u32 %v1352_v12, %v1157_v11 }
  0x20   : > { %920 = vmatpush.bf16.msra.mxu3 %v1393_v26  ;;  %v1382_v16 = vld [vmem:[%s1707_s1 + $0x80] sm:$0xff]  ;;  %v1165_v17 = vld [vmem:[#allocation2 + $0x8] sm:$0xf]  ;;  %440 = vst [vmem:[#allocation2 + $0x24] sm:$0xf] %v359_v5  ;;  %v368_v18 = vrot.slane %v367_v6, 4 }
  0x21   : > { %834 = vmatpush.bf16.msra.mxu0 %v1368_v48  ;;  %v1353_v19 = vld [vmem:[#allocation2 + $0x14] sm:$0xf0]  ;;  %449 = vst [vmem:[#allocation2 + $0x38] sm:$0xf] %v297_v2  ;;  %v377_v20 = vrot.slane %v375_v13, 4  ;;  %v380_v21 = vrot.slane %v378_v14, 5 }
  0x22   : > { %863 = vmatpush.bf16.msra.mxu1 %v1376_v49  ;;  %v1390_v22 = vld [vmem:[%s1707_s1 + $0xc0] sm:$0xff]  ;;  %v373_v24 = vsel %vm1591_vm2, %v368_v18, %v372_v7  ;;  %311 = vst [vmem:[#allocation2 + $0x40] sm:$0xf] %v297_v2  ;;  %v386_v25 = vrot.slane %v384_v15, 5  ;;  %v1159_v26 = vld [vmem:[#allocation2 + $0x10] sm:$0xf0]  ;;  %v1166_v34 = vor.u32 %v1353_v19, %v1165_v17 }
  0x23   : > { %892 = vmatpush.bf16.msra.mxu2 %v1384_v52  ;;  %441 = vst [vmem:[#allocation2 + $0x34] sm:$0xf] %v373_v24  ;;  %v381_v27 = vor.u32 %v380_v21, %v377_v20  ;;  %v299_v28 = vld [vmem:[%s1557_s24 + $0x28] sm:$0xf]  ;;  %v1351_v31 = vld [vmem:[#allocation2 + $0xc] sm:$0xf] }
  0x24   : > { %921 = vmatpush.bf16.msra.mxu3 %v1392_v53  ;;  %471 = vst [vmem:[#allocation2 + $0x2c] sm:$0xf] %v373_v24  ;;  %v389_v32 = vshrl.u32 %v299_v28, 16  ;;  %v392_v33 = vshll.u32 %v299_v28, 16  ;;  %v300_v36 = vld [vmem:[%s1557_s24 + $0x2c] sm:$0x1] }
  0x25   : > { %835 = vmatpush.bf16.msra.mxu0 %v1367_v0  ;;  %v1350_v23 = vld [vmem:[#allocation2 + $0x4] sm:$0xf]  ;;  %v382_v35 = vrot.slane %v381_v27, 4  ;;  %312 = vst [vmem:[#allocation2 + $0x50] sm:$0xf] %v299_v28  ;;  %v398_v43 = vshll.u32 %v300_v36, 16 }
  0x26   : > { %864 = vmatpush.bf16.msra.mxu1 %v1375_v1  ;;  %v1162_v30 = vor.u32 %v1350_v23, %v1159_v26  ;;  %v1167_v37 = vld [vmem:[#allocation2 + $0x18] sm:$0xf0]  ;;  %450 = vst [vmem:[#allocation2 + $0x48] sm:$0xf] %v299_v28  ;;  %v391_v38 = vrot.slane %v389_v32, 4  ;;  %v394_v40 = vrot.slane %v392_v33, 5 }
  0x27   : > { %893 = vmatpush.bf16.msra.mxu2 %v1383_v3  ;;  %v1170_v41 = vor.u32 %v1351_v31, %v1167_v37  ;;  %v387_v42 = vsel %vm1591_vm2, %v382_v35, %v386_v25  ;;  %v301_v44 = vld [vmem:[%s1557_s24 + $0x30] sm:$0xf]  ;;  %v400_v48 = vrot.slane %v398_v43, 5  ;;  %v302_v51 = vld [vmem:[%s1557_s24 + $0x34] sm:$0x1] }
  0x28   : > { %922 = vmatpush.bf16.msra.mxu3 %v1391_v4  ;;  %472 = vst [vmem:[#allocation2 + $0x3c] sm:$0xf] %v387_v42  ;;  %v395_v45 = vor.u32 %v394_v40, %v391_v38  ;;  %v403_v46 = vshrl.u32 %v301_v44, 16  ;;  %v406_v47 = vshll.u32 %v301_v44, 16  ;;  %v412_v54 = vshll.u32 %v302_v51, 16 }
  0x29   : > { %836 = vmatpush.bf16.msra.mxu0 %v1366_v9  ;;  %442 = vst [vmem:[#allocation2 + $0x44] sm:$0xf] %v387_v42  ;;  %v303_v55 = vld [vmem:[%s1557_s24 + $0x38] sm:$0xf]  ;;  %v304_v60 = vld [vmem:[%s1557_s24 + $0x3c] sm:$0x1] }
  0x2a   : > { %865 = vmatpush.bf16.msra.mxu1 %v1374_v10  ;;  %v396_v49 = vrot.slane %v395_v45, 4  ;;  %451 = vst [vmem:[#allocation2 + $0x58] sm:$0xf] %v301_v44  ;;  %v405_v50 = vrot.slane %v403_v46, 4  ;;  %v408_v53 = vrot.slane %v406_v47, 5  ;;  %v417_v56 = vshrl.u32 %v303_v55, 16 }
  0x2b   : > { %894 = vmatpush.bf16.msra.mxu2 %v1382_v16  ;;  %313 = vst [vmem:[#allocation2 + $0x60] sm:$0xf] %v301_v44  ;;  %v420_v57 = vshll.u32 %v303_v55, 16  ;;  %v414_v59 = vrot.slane %v412_v54, 5  ;;  %v1173_v61 = vld [vmem:[#allocation2 + $0x20] sm:$0xf] }
  0x2c   : > { %923 = vmatpush.bf16.msra.mxu3 %v1390_v22  ;;  %837 = vmatmul.bf16.vlgmr.msra.gmra.mxu0 %v1158_v29  ;;  %v401_v52 = vsel %vm1591_vm2, %v396_v49, %v400_v48  ;;  %v409_v58 = vor.u32 %v408_v53, %v405_v50  ;;  %v1356_v62 = vld [vmem:[#allocation2 + $0x2c] sm:$0xf0]  ;;  %v1354_v63 = vld [vmem:[#allocation2 + $0x24] sm:$0xf]  ;;  %314 = vst [vmem:[#allocation2 + $0x70] sm:$0xf] %v303_v55 }
  0x2d   : > { %866 = vmatmul.bf16.vlgmr.msra.gmra.mxu1 %v1162_v30  ;;  %443 = vst [vmem:[#allocation2 + $0x54] sm:$0xf] %v401_v52  ;;  %v419_v0 = vrot.slane %v417_v56, 4  ;;  %v422_v1 = vrot.slane %v420_v57, 5  ;;  %v1175_v2 = vld [vmem:[#allocation2 + $0x30] sm:$0xf0]  ;;  %v1174_v18 = vor.u32 %v1356_v62, %v1173_v61 }
  0x2e   : > { %895 = vmatmul.bf16.vlgmr.msra.gmra.mxu2 %v1166_v34  ;;  %473 = vst [vmem:[#allocation2 + $0x4c] sm:$0xf] %v401_v52  ;;  %v1181_v3 = vld [vmem:[#allocation2 + $0x28] sm:$0xf]  ;;  %v1357_v4 = vld [vmem:[#allocation2 + $0x34] sm:$0xf0]  ;;  %v1178_v19 = vor.u32 %v1354_v63, %v1175_v2 }
  0x2f   : > { %924 = vmatmul.bf16.vlgmr.msra.gmra.mxu3 %v1170_v41  ;;  %v410_v5 = vrot.slane %v409_v58, 4  ;;  %452 = vst [vmem:[#allocation2 + $0x68] sm:$0xf] %v303_v55  ;;  %v426_v6 = vshll.u32 %v304_v60, 16  ;;  %v1355_v7 = vld [vmem:[#allocation2 + $0x2c] sm:$0xf]  ;;  %v423_v8 = vor.u32 %v422_v1, %v419_v0  ;;  %v1182_v21 = vor.u32 %v1357_v4, %v1181_v3 }
  0x30   : > { %v305_v9 = vld [vmem:[%s1557_s24 + $0x40] sm:$0xf]  ;;  %v306_v10 = vld [vmem:[%s1557_s24 + $0x44] sm:$0x1]  ;;  %v1183_v11 = vld [vmem:[#allocation2 + $0x38] sm:$0xf0] }
  0x31   : > { %v415_v12 = vsel %vm1591_vm2, %v410_v5, %v414_v59  ;;  %v428_v13 = vrot.slane %v426_v6, 5  ;;  %453 = vst [vmem:[#allocation2 + $0x78] sm:$0xf] %v305_v9  ;;  %v455_v14 = vshrl.u32 %v305_v9, 16  ;;  %v424_v15 = vrot.slane %v423_v8, 4 }
  0x32   : > { %474 = vst [vmem:[#allocation2 + $0x5c] sm:$0xf] %v415_v12  ;;  %v458_v16 = vshll.u32 %v305_v9, 16  ;;  %v464_v17 = vshll.u32 %v306_v10, 16  ;;  %v1186_v22 = vor.u32 %v1355_v7, %v1183_v11  ;;  %v1189_v29 = vld [vmem:[#allocation2 + $0x40] sm:$0xf] }
  0x33   : > { %444 = vst [vmem:[#allocation2 + $0x64] sm:$0xf] %v415_v12  ;;  %v457_v20 = vrot.slane %v455_v14, 4  ;;  %v429_v23 = vsel %vm1591_vm2, %v424_v15, %v428_v13  ;;  %v1360_v30 = vld [vmem:[#allocation2 + $0x4c] sm:$0xf0] }
  0x34   : > { %v460_v24 = vrot.slane %v458_v16, 5  ;;  %445 = vst [vmem:[#allocation2 + $0x74] sm:$0xf] %v429_v23  ;;  %v466_v26 = vrot.slane %v464_v17, 5  ;;  %v1358_v31 = vld [vmem:[#allocation2 + $0x44] sm:$0xf]  ;;  %v1190_v37 = vor.u32 %v1360_v30, %v1189_v29 }
  0x35   : > { %475 = vst [vmem:[#allocation2 + $0x6c] sm:$0xf] %v429_v23  ;;  %v1191_v32 = vld [vmem:[#allocation2 + $0x50] sm:$0xf0]  ;;  %v1197_v33 = vld [vmem:[#allocation2 + $0x48] sm:$0xf] }
  0x36   : > { %v461_v25 = vor.u32 %v460_v24, %v457_v20  ;;  %v1361_v34 = vld [vmem:[#allocation2 + $0x54] sm:$0xf0]  ;;  %v1359_v35 = vld [vmem:[#allocation2 + $0x4c] sm:$0xf]  ;;  %v1194_v38 = vor.u32 %v1358_v31, %v1191_v32  ;;  %v1205_v42 = vld [vmem:[#allocation2 + $0x60] sm:$0xf] }
  0x37   : > { %v1198_v40 = vor.u32 %v1361_v34, %v1197_v33  ;;  %v1364_v39 = vld [vmem:[#allocation2 + $0x6c] sm:$0xf0]  ;;  %v1213_v45 = vld [vmem:[#allocation2 + $0x68] sm:$0xf]  ;;  %v1664_v62 = vld [vmem:[%s1708_s2] ss:$0 sm:$0xff] }
  0x38   : > { %v462_v27 = vrot.slane %v461_v25, 4  ;;  %v1365_v46 = vld [vmem:[#allocation2 + $0x74] sm:$0xf0]  ;;  %v1206_v49 = vor.u32 %v1364_v39, %v1205_v42  ;;  %v1670_v0 = vld [vmem:[%s1709_s3] ss:$0 sm:$0xff] }
  0x39   : > { %v1199_v36 = vld [vmem:[#allocation2 + $0x58] sm:$0xf0]  ;;  %v1214_v51 = vor.u32 %v1365_v46, %v1213_v45 }
  0x3a   : > { %v467_v28 = vsel %vm1591_vm2, %v462_v27, %v466_v26  ;;  %v1202_v41 = vor.u32 %v1359_v35, %v1199_v36  ;;  %v1362_v43 = vld [vmem:[#allocation2 + $0x64] sm:$0xf] }
  0x3b   : > { %476 = vst [vmem:[#allocation2 + $0x7c] sm:$0xf] %v467_v28  ;;  %v1207_v44 = vld [vmem:[#allocation2 + $0x70] sm:$0xf0] }
  0x3c   : > { %842 = vmatmul.bf16.gmra.mxu0 %v1174_v18  ;;  %v1363_v47 = vld [vmem:[#allocation2 + $0x6c] sm:$0xf]  ;;  %v1210_v50 = vor.u32 %v1362_v43, %v1207_v44 }
  0x3d   : > { %871 = vmatmul.bf16.gmra.mxu1 %v1178_v19 }
  0x3e   : > { %900 = vmatmul.bf16.gmra.mxu2 %v1182_v21 }
  0x3f   : > { %929 = vmatmul.bf16.gmra.mxu3 %v1186_v22 }
  0x42   : > { %v1215_v48 = vld [vmem:[#allocation2 + $0x78] sm:$0xf0] }
  0x43   : > { %v1218_v52 = vor.u32 %v1363_v47, %v1215_v48 }
  0x4c   : > { %847 = vmatmul.bf16.gmra.mxu0 %v1190_v37 }
  0x4d   : > { %876 = vmatmul.bf16.gmra.mxu1 %v1194_v38 }
  0x4e   : > { %905 = vmatmul.bf16.gmra.mxu2 %v1198_v40 }
  0x4f   : > { %934 = vmatmul.bf16.gmra.mxu3 %v1202_v41 }
  0x5c   : > { %852 = vmatmul.bf16.gmra.mxu0 %v1206_v49 }
  0x5d   : > { %881 = vmatmul.bf16.gmra.mxu1 %v1210_v50 }
  0x5e   : > { %910 = vmatmul.bf16.gmra.mxu2 %v1214_v51 }
  0x5f   : > { %939 = vmatmul.bf16.gmra.mxu3 %v1218_v52 }
  0xa9   : > { %v838_v53 = vpop.f32.mrf.mxu0 }
  0xaa   : > { %v867_v54 = vpop.f32.mrf.mxu1 }
  0xab   : > { %v868_v55 = vadd.f32 %v867_v54, %v838_v53 }
  0xb1   : > { %v896_v56 = vpop.f32.mrf.mxu2  ;;  %v840_v59 = vpop.f32.mrf.mxu0 }
  0xb2   : > { %v925_v57 = vpop.f32.mrf.mxu3  ;;  %v897_v58 = vadd.f32 %v896_v56, %v868_v55  ;;  %v869_v60 = vpop.f32.mrf.mxu1 }
  0xb3   : > { %v870_v1 = vadd.f32 %v869_v60, %v840_v59 }
  0xb4   : > { %v926_v61 = vadd.f32 %v925_v57, %v897_v58 }
  0xb6   : > { %v949_v63 = vmul.f32 %v1664_v62, %v926_v61 }
  0xb8   : > { %v961_v7 = vadd.f32 %v1670_v0, %v949_v63 }
  0xb9   : > { %v898_v2 = vpop.f32.mrf.mxu2  ;;  %v843_v5 = vpop.f32.mrf.mxu0 }
  0xba   : > { %v927_v3 = vpop.f32.mrf.mxu3  ;;  %v899_v4 = vadd.f32 %v898_v2, %v870_v1  ;;  %v872_v6 = vpop.f32.mrf.mxu1  ;;  %v977_v11 = vmul.f32 0.1, %v961_v7  ;;  %vm969_vm3 = vcmp.ge.f32.partialorder %v961_v7, 0.0 }
  0xbb   : > { %v873_v10 = vadd.f32 %v872_v6, %v843_v5 }
  0xbc   : > { %v928_v8 = vadd.f32 %v927_v3, %v899_v4  ;;  %v985_v19 = vsel %vm969_vm3, %v961_v7, %v977_v11 }
  0xbe   : > { %v950_v9 = vmul.f32 %v1664_v62, %v928_v8 }
  0xc0   : > { %v962_v12 = vadd.f32 %v1670_v0, %v950_v9 }
  0xc1   : > { %v901_v13 = vpop.f32.mrf.mxu2  ;;  %v845_v17 = vpop.f32.mrf.mxu0 }
  0xc2   : > { %v930_v14 = vpop.f32.mrf.mxu3  ;;  %vm970_vm4 = vcmp.ge.f32.partialorder %v962_v12, 0.0  ;;  %v978_v15 = vmul.f32 0.1, %v962_v12  ;;  %v902_v16 = vadd.f32 %v901_v13, %v873_v10  ;;  %v874_v18 = vpop.f32.mrf.mxu1 }
  0xc3   : > { %v875_v24 = vadd.f32 %v874_v18, %v845_v17 }
  0xc4   : > { %v986_v20 = vsel %vm970_vm4, %v962_v12, %v978_v15  ;;  %v931_v21 = vadd.f32 %v930_v14, %v902_v16 }
  0xc5   : > { %v1401_v22 = vpack.c.bf16 %v986_v20, %v985_v19 }
  0xc6   : > { %v951_v23 = vmul.f32 %v1664_v62, %v931_v21 }
  0xc7   : > { %1402 = vst [vmem:[%s1679_s29] sm:$0xff] %v1401_v22  }
  0xc8   : > { %v963_v30 = vadd.f32 %v1670_v0, %v951_v23 }
  0xc9   : > { %v903_v25 = vpop.f32.mrf.mxu2  ;;  %v848_v28 = vpop.f32.mrf.mxu0 }
  0xca   : > { %v932_v26 = vpop.f32.mrf.mxu3  ;;  %v904_v27 = vadd.f32 %v903_v25, %v875_v24  ;;  %v877_v29 = vpop.f32.mrf.mxu1  ;;  %v979_v34 = vmul.f32 0.1, %v963_v30  ;;  %vm971_vm5 = vcmp.ge.f32.partialorder %v963_v30, 0.0 }
  0xcb   : > { %v878_v33 = vadd.f32 %v877_v29, %v848_v28 }
  0xcc   : > { %v933_v31 = vadd.f32 %v932_v26, %v904_v27  ;;  %v987_v39 = vsel %vm971_vm5, %v963_v30, %v979_v34 }
  0xce   : > { %v952_v32 = vmul.f32 %v1664_v62, %v933_v31 }
  0xd0   : > { %v964_v35 = vadd.f32 %v1670_v0, %v952_v32 }
  0xd1   : > { %v906_v36 = vpop.f32.mrf.mxu2  ;;  %v850_v41 = vpop.f32.mrf.mxu0 }
  0xd2   : > { %v935_v37 = vpop.f32.mrf.mxu3  ;;  %vm972_vm6 = vcmp.ge.f32.partialorder %v964_v35, 0.0  ;;  %v980_v38 = vmul.f32 0.1, %v964_v35  ;;  %v907_v40 = vadd.f32 %v906_v36, %v878_v33  ;;  %v879_v42 = vpop.f32.mrf.mxu1 }
  0xd3   : > { %v880_v47 = vadd.f32 %v879_v42, %v850_v41 }
  0xd4   : > { %v988_v43 = vsel %vm972_vm6, %v964_v35, %v980_v38  ;;  %v936_v44 = vadd.f32 %v935_v37, %v907_v40 }
  0xd5   : > { %v1406_v45 = vpack.c.bf16 %v988_v43, %v987_v39 }
  0xd6   : > { %v953_v46 = vmul.f32 %v1664_v62, %v936_v44 }
  0xd7   : > { %1418 = vst [vmem:[%s1679_s29 + $0x8] sm:$0xff] %v1406_v45  }
  0xd8   : > { %v965_v53 = vadd.f32 %v1670_v0, %v953_v46 }
  0xd9   : > { %v908_v48 = vpop.f32.mrf.mxu2  ;;  %v853_v51 = vpop.f32.mrf.mxu0 }
  0xda   : > { %v937_v49 = vpop.f32.mrf.mxu3  ;;  %v909_v50 = vadd.f32 %v908_v48, %v880_v47  ;;  %v882_v52 = vpop.f32.mrf.mxu1  ;;  %v981_v57 = vmul.f32 0.1, %v965_v53  ;;  %vm973_vm7 = vcmp.ge.f32.partialorder %v965_v53, 0.0 }
  0xdb   : > { %v883_v56 = vadd.f32 %v882_v52, %v853_v51 }
  0xdc   : > { %v938_v54 = vadd.f32 %v937_v49, %v909_v50  ;;  %v989_v1 = vsel %vm973_vm7, %v965_v53, %v981_v57 }
  0xde   : > { %v954_v55 = vmul.f32 %v1664_v62, %v938_v54 }
  0xe0   : > { %v966_v58 = vadd.f32 %v1670_v0, %v954_v55 }
  0xe1   : > { %v911_v59 = vpop.f32.mrf.mxu2  ;;  %v855_v5 = vpop.f32.mrf.mxu0 }
  0xe2   : > { %v940_v60 = vpop.f32.mrf.mxu3  ;;  %vm974_vm8 = vcmp.ge.f32.partialorder %v966_v58, 0.0  ;;  %v982_v61 = vmul.f32 0.1, %v966_v58  ;;  %v912_v63 = vadd.f32 %v911_v59, %v883_v56  ;;  %v884_v6 = vpop.f32.mrf.mxu1 }
  0xe3   : > { %v885_v8 = vadd.f32 %v884_v6, %v855_v5 }
  0xe4   : > { %v990_v2 = vsel %vm974_vm8, %v966_v58, %v982_v61  ;;  %v941_v3 = vadd.f32 %v940_v60, %v912_v63 }
  0xe5   : > { %v1411_v4 = vpack.c.bf16 %v990_v2, %v989_v1 }
  0xe6   : > { %v955_v7 = vmul.f32 %v1664_v62, %v941_v3 }
  0xe7   : > { %1419 = vst [vmem:[%s1679_s29 + $0x10] sm:$0xff] %v1411_v4  }
  0xe8   : > { %v967_v12 = vadd.f32 %v1670_v0, %v955_v7 }
  0xe9   : > { %v913_v9 = vpop.f32.mrf.mxu2 }
  0xea   : > { %v914_v10 = vadd.f32 %v913_v9, %v885_v8  ;;  %v942_v11 = vpop.f32.mrf.mxu3  ;;  %v983_v15 = vmul.f32 0.1, %v967_v12  ;;  %vm975_vm9 = vcmp.ge.f32.partialorder %v967_v12, 0.0 }
  0xec   : > { %v943_v13 = vadd.f32 %v942_v11, %v914_v10  ;;  %v991_v18 = vsel %vm975_vm9, %v967_v12, %v983_v15 }
  0xee   : > { %v956_v14 = vmul.f32 %v1664_v62, %v943_v13 }
  0xf0   : > { %v968_v16 = vadd.f32 %v1670_v0, %v956_v14 }
  0xf2   : > { %vm976_vm10 = vcmp.ge.f32.partialorder %v968_v16, 0.0  ;;  %v984_v17 = vmul.f32 0.1, %v968_v16 }
  0xf4   : > { %v992_v19 = vsel %vm976_vm10, %v968_v16, %v984_v17 }
  0xf5   : > { %v1416_v20 = vpack.c.bf16 %v992_v19, %v991_v18 }
  0xf7   : > { %1420 = vst [vmem:[%s1679_s29 + $0x18] sm:$0xff] %v1416_v20  }
  0xf8 PF: > { %s14_s17 = sadd.s32 1, %s1470_s17   ;;  %s1713_s15 = smov %s1466_s16 }
  0xf9   : > { %p11_p5 = scmp.ge.s32.totalorder %s14_s17, 4   ;;  %s1714_s16 = smov %s1716_s18 }
  0xfb   :  { %13 = sbr.rel (!%p11_p5) target bundleno = 2 (0x2), region = 80 }

// kernel: basic_block_forward.3
= control target key start
LH: loop header
LB: loop body
LE: loop exit
PB: predicated region body
PF: predicated region fallthrough
CT: control target
= control target key end

     0   :  { %s2686_s15 = smov 0   ;;  %s2688_s16 = smov 0   ;;  %s3207_s0 = inlined_call_operand.vmem [shape: bf16[2,10,10,128], index: 0, kind: input, shape index: {}]   ;;  %s3208_s1 = inlined_call_operand.vmem [shape: bf16[1152,128], index: 1, kind: input, shape index: {}]   ;;  %s3209_s2 = inlined_call_operand.vmem [shape: bf16[2,8,8,128], index: 2, kind: input, shape index: {}]   ;;  %s3210_s3 = inlined_call_operand.vmem [shape: bf16[128,128], index: 3, kind: input, shape index: {}]   ;;  %s3211_s4 = inlined_call_operand.vmem [shape: f32[2,8,8,128], index: 4, kind: output, shape index: {}]  }
   0x1   :  { %s2690_s17 = smov 0  }
   0x2 LB: > { %s33_s18 = sadd.s32 1, %s2655_s16  ;;  %p1976_p0 = scmp.ge.s32.totalorder %s2659_s17, 1  ;;  %s2659_s17 = sphi %s2690_s17, %s14_s17   ;;  %s2655_s16 = sphi %s2688_s16, %s3217_s16   ;;  %s2651_s15 = sphi %s2686_s15, %s3216_s15  }
   0x3   : > { %p35_p1 = scmp.ge.s32.totalorder %s33_s18, 2  ;;  %p220_p2 = scmp.lt.s32.totalorder %s2659_s17, 3 }
   0x5   : > { %s3219_s18 = smov (%p35_p1, %s33_s18), 0  ;;  %p221_p3 = pnand %p1976_p0, %p220_p2 }
   0x6   : > { %p270_p4 = scmp.lt.s32.totalorder (!%p221_p3), %s2651_s15, 1 }
   0x7   : > { %224 = sbr.rel (%p221_p3) target bundleno = 337 (0x151), region = 36 }
   0xc   : > { %v2595_v0 = vld [vmem:[%s3210_s3 + $0x38] sm:$0xff]  ;;  %v2594_v2 = vld [vmem:[%s3210_s3 + $0x30] sm:$0xff]  ;;  %s3221_s15 = smov (!%p270_p4, %s2651_s15), 1  ;;  %v2593_v4 = vld [vmem:[%s3210_s3 + $0x28] sm:$0xff]  ;;  %vm342_vm0 = vsmask.f32 3328 }
   0xd   : > { %v2519_v1 = vld [vmem:[%s3208_s1 + $0x38] sm:$0xff]  ;;  %2596 = vmatpush.bf16.msra.mxu2 %v2595_v0  ;;  %v2518_v3 = vld [vmem:[%s3208_s1 + $0x30] sm:$0xff]  ;;  %912 = vmatpush.bf16.msra.mxu0 %v2595_v0  ;;  %s2612_s27 = smul.u32 80, %s3221_s15  ;;  %v2517_v5 = vld [vmem:[%s3208_s1 + $0x28] sm:$0xff]  ;;  %s2474_s29 = sshll.u32 %s3221_s15, 5  ;;  %vm489_vm3 = vcmask 1042432  }
   0xe   : > { %2604 = vmatpush.bf16.msra.mxu3 %v2519_v1  ;;  %1557 = vmatpush.bf16.msra.mxu1 %v2519_v1  ;;  %v2592_v9 = vld [vmem:[%s3210_s3 + $0x20] sm:$0xff]  ;;  %v2591_v14 = vld [vmem:[%s3210_s3 + $0x18] sm:$0xff]  ;;  %v2590_v20 = vld [vmem:[%s3210_s3 + $0x10] sm:$0xff]  ;;  %vm343_vm1 = vsmask.f32 7440  ;;  %s2815_s9 = scalar_lea.vmem %s3209_s2, %s2474_s29  ;;  %vm490_vm4 = vcmask 1046532  }
   0xf   : > { %s2728_s8 = scalar_lea.vmem %s3207_s0, %s2612_s27  ;;  %v2516_v10 = vld [vmem:[%s3208_s1 + $0x20] sm:$0xff]  ;;  %v2515_v15 = vld [vmem:[%s3208_s1 + $0x18] sm:$0xff]  ;;  %v2514_v21 = vld [vmem:[%s3208_s1 + $0x10] sm:$0xff] }
  0x10   : > { %v2731_v6 = vld [vmem:[%s2728_s8 + $0x20] sm:$0xf]  ;;  %v2734_v7 = vld [vmem:[%s2728_s8 + $0x28] sm:$0xf]  ;;  %v2764_v18 = vld [vmem:[%s2728_s8 + $0x30] sm:$0xf] }
  0x11   : > { %2597 = vmatpush.bf16.msra.mxu2 %v2594_v2  ;;  %913 = vmatpush.bf16.msra.mxu0 %v2594_v2  ;;  %338 = vst [vmem:[#allocation2 + $0x90] sm:$0xf] %v2731_v6  ;;  %v2739_v8 = vld [vmem:[%s2728_s8] sm:$0xf]  ;;  %v2753_v13 = vld [vmem:[%s2728_s8 + $0x8] sm:$0xf]  ;;  %vm2803_vm2 = vmor %vm342_vm0, %vm343_vm1 }
  0x12   : > { %2605 = vmatpush.bf16.msra.mxu3 %v2518_v3  ;;  %1558 = vmatpush.bf16.msra.mxu1 %v2518_v3  ;;  %339 = vst [vmem:[#allocation2 + $0xb4] sm:$0xf] %v2734_v7  ;;  %v346_v11 = vshrl.u32 %v2739_v8, 16  ;;  %v349_v12 = vshll.u32 %v2739_v8, 16  ;;  %v2768_v19 = vld [vmem:[%s2728_s8 + $0x38] sm:$0xf]  ;;  %vm2825_vm5 = vmor %vm489_vm3, %vm490_vm4 }
  0x13   : > { %543 = vst [vmem:[#allocation2 + $0x78] sm:$0xf] %v2731_v6  ;;  %v2780_v22 = vld [vmem:[%s2728_s8 + $0x4] sm:$0x1]  ;;  %v360_v25 = vshrl.u32 %v2753_v13, 16  ;;  %v2589_v26 = vld [vmem:[%s3210_s3 + $0x8] sm:$0xff] }
  0x14   : > { %544 = vst [vmem:[#allocation2 + $0x9c] sm:$0xf] %v2734_v7  ;;  %v348_v16 = vrot.slane %v346_v11, 4  ;;  %v351_v17 = vrot.slane %v349_v12, 5  ;;  %v355_v24 = vshll.u32 %v2780_v22, 16  ;;  %v2513_v27 = vld [vmem:[%s3208_s1 + $0x8] sm:$0xff] }
  0x15   : > { %2598 = vmatpush.bf16.msra.mxu2 %v2593_v4  ;;  %914 = vmatpush.bf16.msra.mxu0 %v2593_v4  ;;  %588 = vst [vmem:[#allocation2 + $0x60] sm:$0xf] %v2731_v6  ;;  %v2793_v28 = vld [vmem:[%s2728_s8 + $0x10] sm:$0xf]  ;;  %v317_v29 = vld [vmem:[%s2728_s8 + $0xc] sm:$0x1] }
  0x16   : > { %2606 = vmatpush.bf16.msra.mxu3 %v2517_v5  ;;  %1559 = vmatpush.bf16.msra.mxu1 %v2517_v5  ;;  %589 = vst [vmem:[#allocation2 + $0x84] sm:$0xf] %v2734_v7  ;;  %v352_v23 = vor.u32 %v351_v17, %v348_v16  ;;  %v2798_v30 = vld [vmem:[%s2728_s8 + $0x18] sm:$0xf]  ;;  %v357_v33 = vrot.slane %v355_v24, 5  ;;  %v362_v34 = vrot.slane %v360_v25, 4 }
  0x17   : > { %334 = vst [vmem:[#allocation2] sm:$0xf] %v2739_v8  ;;  %v363_v35 = vshll.u32 %v2753_v13, 16  ;;  %v369_v36 = vshll.u32 %v317_v29, 16  ;;  %v2588_v39 = vld [vmem:[%s3210_s3] sm:$0xff]  ;;  %v1982_v48 = vrot.slane %v2739_v8, 9 }
  0x18   : > { %335 = vst [vmem:[#allocation2 + $0x24] sm:$0xf] %v2753_v13  ;;  %v353_v31 = vrot.slane %v352_v23, 4  ;;  %v2114_v37 = vld [vmem:[#allocation2 + $0x90] sm:$0xf]  ;;  %v2512_v43 = vld [vmem:[%s3208_s1] sm:$0xff] }
  0x19   : > { %2599 = vmatpush.bf16.msra.mxu2 %v2592_v9  ;;  %915 = vmatpush.bf16.msra.mxu0 %v2592_v9  ;;  %540 = vst [vmem:[#allocation2 + $0xc] sm:$0xf] %v2753_v13  ;;  %v2498_v38 = vld [vmem:[#allocation2 + $0xb0] sm:$0xf0]  ;;  %v365_v42 = vrot.slane %v363_v35, 5  ;;  %v371_v45 = vrot.slane %v369_v36, 5 }
  0x1a   : > { %2607 = vmatpush.bf16.msra.mxu3 %v2516_v10  ;;  %1560 = vmatpush.bf16.msra.mxu1 %v2516_v10  ;;  %340 = vst [vmem:[#allocation2 + $0xd8] sm:$0xf] %v2764_v18  ;;  %v358_v44 = vsel %vm2803_vm2, %v353_v31, %v357_v33  ;;  %v494_v49 = vrot.slane %v2780_v22, 5  ;;  %v1983_v50 = vrot.slane %v2753_v13, 9  ;;  %v2586_v51 = vld [vmem:[%s2815_s9 + $0x10] sm:$0xff]  ;;  %v2527_v52 = vld [vmem:[%s3208_s1 + $0x78] sm:$0xff]  ;;  %v2115_v55 = vor.u32 %v2498_v38, %v2114_v37 }
  0x1b   : > { %341 = vst [vmem:[#allocation2 + $0xfc] sm:$0xf] %v2768_v19  ;;  %v366_v46 = vor.u32 %v365_v42, %v362_v34  ;;  %v2535_v53 = vld [vmem:[%s3208_s1 + $0xb8] sm:$0xff]  ;;  %v498_v54 = vrot.slane %v317_v29, 5  ;;  %v2843_v58 = vld [vmem:[%s2728_s8 + $0x14] sm:$0x1] }
  0x1c   : > { %545 = vst [vmem:[#allocation2 + $0xc0] sm:$0xf] %v2764_v18  ;;  %v495_v57 = vsel %vm2825_vm5, %v1982_v48, %v494_v49  ;;  %v374_v59 = vshrl.u32 %v2793_v28, 16  ;;  %v2584_v60 = vld [vmem:[%s2815_s9] sm:$0xff]  ;;  %v377_v63 = vshll.u32 %v2793_v28, 16  ;;  %v383_v0 = vshll.u32 %v2843_v58, 16 }
  0x1d   : > { %2600 = vmatpush.bf16.msra.mxu2 %v2591_v14  ;;  %916 = vmatpush.bf16.msra.mxu0 %v2591_v14  ;;  %546 = vst [vmem:[#allocation2 + $0xe4] sm:$0xf] %v2768_v19  ;;  %v367_v56 = vrot.slane %v366_v46, 4  ;;  %v499_v62 = vsel %vm2825_vm5, %v1983_v50, %v498_v54  ;;  %v2543_v1 = vld [vmem:[%s3208_s1 + $0xf8] sm:$0xff]  ;;  %v388_v5 = vshrl.u32 %v2798_v30, 16  ;;  %v2526_v8 = vld [vmem:[%s3208_s1 + $0x70] sm:$0xff] }
  0x1e   : > { %2608 = vmatpush.bf16.msra.mxu3 %v2515_v15  ;;  %1561 = vmatpush.bf16.msra.mxu1 %v2515_v15  ;;  %590 = vst [vmem:[#allocation2 + $0xa8] sm:$0xf] %v2764_v18  ;;  %v2042_v40 = vld [vmem:[#allocation2] sm:$0xf]  ;;  %v2551_v2 = vld [vmem:[%s3208_s1 + $0x138] sm:$0xff]  ;;  %v376_v4 = vrot.slane %v374_v59, 4 }
  0x1f   : > { %591 = vst [vmem:[#allocation2 + $0xcc] sm:$0xf] %v2768_v19  ;;  %v2480_v41 = vld [vmem:[#allocation2 + $0x20] sm:$0xf0]  ;;  %v372_v3 = vsel %vm2803_vm2, %v367_v56, %v371_v45  ;;  %v2534_v9 = vld [vmem:[%s3208_s1 + $0xb0] sm:$0xff]  ;;  %v379_v10 = vrot.slane %v377_v63, 5 }
  0x20   : > { %336 = vst [vmem:[#allocation2 + $0x48] sm:$0xf] %v2793_v28  ;;  %v2043_v61 = vor.u32 %v2480_v41, %v2042_v40  ;;  %v385_v12 = vrot.slane %v383_v0, 5  ;;  %v321_v13 = vld [vmem:[%s2728_s8 + $0x1c] sm:$0x1]  ;;  %v2542_v14 = vld [vmem:[%s3208_s1 + $0xf0] sm:$0xff] }
  0x21   : > { %2601 = vmatpush.bf16.msra.mxu2 %v2590_v20  ;;  %917 = vmatpush.bf16.msra.mxu0 %v2590_v20  ;;  %337 = vst [vmem:[#allocation2 + $0x6c] sm:$0xf] %v2798_v30  ;;  %v380_v11 = vor.u32 %v379_v10, %v376_v4  ;;  %v2550_v15 = vld [vmem:[%s3208_s1 + $0x130] sm:$0xff]  ;;  %v390_v16 = vrot.slane %v388_v5, 4  ;;  %v391_v17 = vshll.u32 %v2798_v30, 16  ;;  %v397_v20 = vshll.u32 %v321_v13, 16 }
  0x22   : > { %2609 = vmatpush.bf16.msra.mxu3 %v2514_v21  ;;  %1562 = vmatpush.bf16.msra.mxu1 %v2514_v21  ;;  %541 = vst [vmem:[#allocation2 + $0x30] sm:$0xf] %v2793_v28  ;;  %v2525_v21 = vld [vmem:[%s3208_s1 + $0x68] sm:$0xff]  ;;  %v1984_v24 = vrot.slane %v2793_v28, 9  ;;  %v502_v25 = vrot.slane %v2843_v58, 5  ;;  %v506_v29 = vrot.slane %v321_v13, 5 }
  0x23   : > { %542 = vst [vmem:[#allocation2 + $0x54] sm:$0xf] %v2798_v30  ;;  %v2533_v22 = vld [vmem:[%s3208_s1 + $0xa8] sm:$0xff]  ;;  %v381_v23 = vrot.slane %v380_v11, 4  ;;  %v402_v31 = vshrl.u32 %v2731_v6, 16  ;;  %v405_v35 = vshll.u32 %v2731_v6, 16 }
  0x24   : > { %586 = vst [vmem:[#allocation2 + $0x18] sm:$0xf] %v2793_v28  ;;  %v2887_v34 = vld [vmem:[%s2728_s8 + $0x24] sm:$0x1]  ;;  %v2541_v28 = vld [vmem:[%s3208_s1 + $0xe8] sm:$0xff]  ;;  %v399_v37 = vrot.slane %v397_v20, 5  ;;  %v503_v38 = vsel %vm2825_vm5, %v1984_v24, %v502_v25 }
  0x25   : > { %2602 = vmatpush.bf16.msra.mxu2 %v2589_v26  ;;  %918 = vmatpush.bf16.msra.mxu0 %v2589_v26  ;;  %587 = vst [vmem:[#allocation2 + $0x3c] sm:$0xf] %v2798_v30  ;;  %v1985_v26 = vrot.slane %v2798_v30, 9  ;;  %v386_v33 = vsel %vm2803_vm2, %v381_v23, %v385_v12  ;;  %v2549_v30 = vld [vmem:[%s3208_s1 + $0x128] sm:$0xff]  ;;  %v2532_v40 = vld [vmem:[%s3208_s1 + $0xa0] sm:$0xff]  ;;  %v404_v42 = vrot.slane %v402_v31, 4 }
  0x26   : > { %2610 = vmatpush.bf16.msra.mxu3 %v2513_v27  ;;  %1563 = vmatpush.bf16.msra.mxu1 %v2513_v27  ;;  %465 = vst [vmem:[#allocation2 + $0x4] sm:$0xf] %v358_v44  ;;  %v393_v27 = vrot.slane %v391_v17, 5  ;;  %v2540_v44 = vld [vmem:[%s3208_s1 + $0xe0] sm:$0xff]  ;;  %v411_v48 = vshll.u32 %v2887_v34, 16  ;;  %v2531_v56 = vld [vmem:[%s3208_s1 + $0x98] sm:$0xff] }
  0x27   : > { %532 = vst [vmem:[#allocation2 + $0x8] sm:$0xf] %v495_v57  ;;  %v507_v41 = vsel %vm2825_vm5, %v1985_v26, %v506_v29  ;;  %v2548_v45 = vld [vmem:[%s3208_s1 + $0x120] sm:$0xff]  ;;  %v2150_v49 = vld [vmem:[#allocation2 + $0xd8] sm:$0xf]  ;;  %v416_v63 = vshrl.u32 %v2734_v7, 16 }
  0x28   : > { %533 = vst [vmem:[#allocation2 + $0x2c] sm:$0xf] %v499_v62  ;;  %v394_v36 = vor.u32 %v393_v27, %v390_v16  ;;  %v2507_v50 = vld [vmem:[#allocation2 + $0xf8] sm:$0xf0]  ;;  %v413_v58 = vrot.slane %v411_v48, 5  ;;  %v419_v5 = vshll.u32 %v2734_v7, 16 }
  0x29   : > { %2603 = vmatpush.bf16.msra.mxu2 %v2588_v39  ;;  %919 = vmatpush.bf16.msra.mxu0 %v2588_v39  ;;  %466 = vst [vmem:[#allocation2 + $0x28] sm:$0xf] %v372_v3  ;;  %v2524_v39 = vld [vmem:[%s3208_s1 + $0x60] sm:$0xff]  ;;  %v2587_v59 = vld [vmem:[%s2815_s9 + $0x18] sm:$0xff]  ;;  %v2546_v10 = vld [vmem:[%s3208_s1 + $0x110] sm:$0xff]  ;;  %v510_v23 = vrot.slane %v2887_v34, 5 }
  0x2a   : > { %2611 = vmatpush.bf16.msra.mxu3 %v2512_v43  ;;  %1564 = vmatpush.bf16.msra.mxu1 %v2512_v43  ;;  %563 = vst [vmem:[#allocation2 + $0x10] sm:$0xf] %v372_v3  ;;  %v407_v43 = vrot.slane %v405_v35, 5  ;;  %v395_v46 = vrot.slane %v394_v36, 4  ;;  %v2539_v0 = vld [vmem:[%s3208_s1 + $0xd8] sm:$0xff]  ;;  %v2530_v3 = vld [vmem:[%s3208_s1 + $0x90] sm:$0xff] }
  0x2b   : > { %578 = vst [vmem:[#allocation2 + $0x14] sm:$0xf] %v499_v62  ;;  %v2521_v11 = vld [vmem:[%s3208_s1 + $0x48] sm:$0xff]  ;;  %v421_v13 = vrot.slane %v419_v5, 5  ;;  %v2520_v16 = vld [vmem:[%s3208_s1 + $0x40] sm:$0xff]  ;;  %v2559_v26 = vld [vmem:[%s3208_s1 + $0x178] sm:$0xff] }
  0x2c   : > { %930 = vmatmul.bf16.vlgmr.msra.gmra.mxu2 %v2586_v51  ;;  %920 = vmatmul.bf16.vlgmr.msra.gmra.mxu0 %v2584_v60  ;;  %564 = vst [vmem:[#allocation2 + $0x34] sm:$0xf] %v386_v33  ;;  %v408_v51 = vor.u32 %v407_v43, %v404_v42  ;;  %v400_v54 = vsel %vm2803_vm2, %v395_v46, %v399_v37  ;;  %v2529_v12 = vld [vmem:[%s3208_s1 + $0x88] sm:$0xff]  ;;  %v2528_v17 = vld [vmem:[%s3208_s1 + $0x80] sm:$0xff]  ;;  %v2964_v24 = vld [vmem:[%s2728_s8 + $0x34] sm:$0x1] }
  0x2d   : > { %1586 = vmatpush.bf16.msrb.mxu2 %v2527_v52  ;;  %1575 = vmatmul.bf16.vlgmr.msra.gmra.mxu3 %v2115_v55  ;;  %467 = vst [vmem:[#allocation2 + $0x4c] sm:$0xf] %v386_v33  ;;  %v2078_v52 = vld [vmem:[#allocation2 + $0x48] sm:$0xf]  ;;  %v2523_v55 = vld [vmem:[%s3208_s1 + $0x58] sm:$0xff]  ;;  %v2151_v60 = vor.u32 %v2507_v50, %v2150_v49  ;;  %v1987_v27 = vrot.slane %v2734_v7, 9 }
  0x2e   : > { %1615 = vmatpush.bf16.msrb.mxu3 %v2535_v53  ;;  %1565 = vmatmul.bf16.vlgmr.msra.gmra.mxu1 %v2043_v61  ;;  %609 = vst [vmem:[#allocation2 + $0x1c] sm:$0xf] %v386_v33  ;;  %v2489_v53 = vld [vmem:[#allocation2 + $0x68] sm:$0xf0]  ;;  %v409_v57 = vrot.slane %v408_v51, 4  ;;  %v430_v31 = vshrl.u32 %v2764_v18, 16 }
  0x2f   : > { %1644 = vmatpush.bf16.msrb.mxu0 %v2543_v1  ;;  %1673 = vmatpush.bf16.msrb.mxu1 %v2551_v2  ;;  %534 = vst [vmem:[#allocation2 + $0x50] sm:$0xf] %v503_v38  ;;  %v2585_v61 = vld [vmem:[%s2815_s9 + $0x8] sm:$0xff]  ;;  %v2079_v62 = vor.u32 %v2489_v53, %v2078_v52  ;;  %v2547_v1 = vld [vmem:[%s3208_s1 + $0x118] sm:$0xff]  ;;  %v2522_v2 = vld [vmem:[%s3208_s1 + $0x50] sm:$0xff]  ;;  %v439_v36 = vshll.u32 %v2964_v24, 16 }
  0x30   : > { %535 = vst [vmem:[#allocation2 + $0x74] sm:$0xf] %v507_v41  ;;  %v414_v4 = vsel %vm2803_vm2, %v409_v57, %v413_v58  ;;  %v2545_v25 = vld [vmem:[%s3208_s1 + $0x108] sm:$0xff]  ;;  %v2476_v33 = vld [vmem:[#allocation2 + $0x4] sm:$0xf]  ;;  %v2567_v34 = vld [vmem:[%s3208_s1 + $0x1b8] sm:$0xff] }
  0x31   : > { %1587 = vmatpush.bf16.msrb.mxu2 %v2526_v8  ;;  %468 = vst [vmem:[#allocation2 + $0x70] sm:$0xf] %v400_v54  ;;  %v418_v8 = vrot.slane %v416_v63, 4  ;;  %v2536_v7 = vld [vmem:[%s3208_s1 + $0xc0] sm:$0xff]  ;;  %v2050_v37 = vld [vmem:[#allocation2 + $0x8] sm:$0xf] }
  0x32   : > { %1616 = vmatpush.bf16.msrb.mxu3 %v2534_v9  ;;  %610 = vst [vmem:[#allocation2 + $0x40] sm:$0xf] %v400_v54  ;;  %v2538_v9 = vld [vmem:[%s3208_s1 + $0xd0] sm:$0xff]  ;;  %v432_v42 = vrot.slane %v430_v31, 4  ;;  %v2575_v51 = vld [vmem:[%s3208_s1 + $0x1f8] sm:$0xff]  ;;  %v441_v53 = vrot.slane %v439_v36, 5 }
  0x33   : > { %1645 = vmatpush.bf16.msrb.mxu0 %v2542_v14  ;;  %1674 = vmatpush.bf16.msrb.mxu1 %v2550_v15  ;;  %565 = vst [vmem:[#allocation2 + $0x58] sm:$0xf] %v400_v54  ;;  %v2537_v14 = vld [vmem:[%s3208_s1 + $0xc8] sm:$0xff]  ;;  %v422_v20 = vor.u32 %v421_v13, %v418_v8  ;;  %v2058_v48 = vld [vmem:[#allocation2 + $0x10] sm:$0xf]  ;;  %v2583_v52 = vld [vmem:[%s3208_s1 + $0x238] sm:$0xff] }
  0x34   : > { %579 = vst [vmem:[#allocation2 + $0x38] sm:$0xf] %v503_v38  ;;  %v325_v15 = vld [vmem:[%s2728_s8 + $0x2c] sm:$0x1]  ;;  %v2482_v49 = vld [vmem:[#allocation2 + $0x30] sm:$0xf0] }
  0x35   : > { %1588 = vmatpush.bf16.msrb.mxu2 %v2525_v21  ;;  %624 = vst [vmem:[#allocation2 + $0x20] sm:$0xf] %v503_v38  ;;  %v425_v21 = vshll.u32 %v325_v15, 16  ;;  %v514_v29 = vrot.slane %v325_v15, 5  ;;  %v423_v35 = vrot.slane %v422_v20, 4  ;;  %v2544_v38 = vld [vmem:[%s3208_s1 + $0x100] sm:$0xff]  ;;  %v2059_v58 = vor.u32 %v2482_v49, %v2058_v48 }
  0x36   : > { %1617 = vmatpush.bf16.msrb.mxu3 %v2533_v22  ;;  %625 = vst [vmem:[#allocation2 + $0x44] sm:$0xf] %v507_v41  ;;  %v1986_v22 = vrot.slane %v2731_v6, 9  ;;  %v433_v6 = vshll.u32 %v2764_v18, 16  ;;  %v2574_v63 = vld [vmem:[%s3208_s1 + $0x1f0] sm:$0xff]  ;;  %v2565_v5 = vld [vmem:[%s3208_s1 + $0x1a8] sm:$0xff] }
  0x37   : > { %1646 = vmatpush.bf16.msrb.mxu0 %v2541_v28  ;;  %1675 = vmatpush.bf16.msrb.mxu1 %v2549_v30  ;;  %580 = vst [vmem:[#allocation2 + $0x5c] sm:$0xf] %v507_v41  ;;  %v427_v28 = vrot.slane %v425_v21, 5  ;;  %v515_v41 = vsel %vm2825_vm5, %v1987_v27, %v514_v29  ;;  %v2573_v8 = vld [vmem:[%s3208_s1 + $0x1e8] sm:$0xff]  ;;  %v2564_v13 = vld [vmem:[%s3208_s1 + $0x1a0] sm:$0xff]  ;;  %v518_v15 = vrot.slane %v2964_v24, 5 }
  0x38   : > { %566 = vst [vmem:[#allocation2 + $0x7c] sm:$0xf] %v414_v4  ;;  %v511_v30 = vsel %vm2825_vm5, %v1986_v22, %v510_v23  ;;  %v435_v43 = vrot.slane %v433_v6, 5  ;;  %v1989_v20 = vrot.slane %v2768_v19, 9  ;;  %v3036_v22 = vld [vmem:[%s2728_s8 + $0x40] sm:$0xf] }
  0x39   : > { %1589 = vmatpush.bf16.msrb.mxu2 %v2524_v39  ;;  %469 = vst [vmem:[#allocation2 + $0x94] sm:$0xf] %v414_v4  ;;  %v2477_v39 = vld [vmem:[#allocation2 + $0xc] sm:$0xf]  ;;  %v428_v46 = vsel %vm2803_vm2, %v423_v35, %v427_v28  ;;  %v3042_v23 = vld [vmem:[%s2728_s8 + $0x44] sm:$0x1] }
  0x3a   : > { %1618 = vmatpush.bf16.msrb.mxu3 %v2532_v40  ;;  %611 = vst [vmem:[#allocation2 + $0x64] sm:$0xf] %v414_v4  ;;  %v2052_v40 = vld [vmem:[#allocation2 + $0x2c] sm:$0xf0]  ;;  %v436_v50 = vor.u32 %v435_v43, %v432_v42  ;;  %v2557_v4 = vld [vmem:[%s3208_s1 + $0x168] sm:$0xff]  ;;  %v552_v24 = vshll.u32 %v3036_v22, 16 }
  0x3b   : > { %1647 = vmatpush.bf16.msrb.mxu0 %v2540_v44  ;;  %1676 = vmatpush.bf16.msrb.mxu1 %v2548_v45  ;;  %536 = vst [vmem:[#allocation2 + $0x98] sm:$0xf] %v511_v30  ;;  %v2044_v44 = vld [vmem:[#allocation2 + $0x24] sm:$0xf0]  ;;  %v2481_v45 = vld [vmem:[#allocation2 + $0x28] sm:$0xf0]  ;;  %v2055_v57 = vor.u32 %v2477_v39, %v2052_v40 }
  0x3c   : > { %935 = vmatmul.bf16.gmra.mxu2 %v2587_v59  ;;  %925 = vmatmul.bf16.gmra.mxu0 %v2585_v61  ;;  %537 = vst [vmem:[#allocation2 + $0xbc] sm:$0xf] %v515_v41  ;;  %v2047_v54 = vor.u32 %v2476_v33, %v2044_v44  ;;  %v444_v59 = vshrl.u32 %v2768_v19, 16  ;;  %v2558_v61 = vld [vmem:[%s3208_s1 + $0x170] sm:$0xff]  ;;  %v2580_v31 = vld [vmem:[%s3208_s1 + $0x220] sm:$0xff]  ;;  %v2555_v40 = vld [vmem:[%s3208_s1 + $0x158] sm:$0xff] }
  0x3d   : > { %1590 = vmatpush.bf16.msrb.mxu2 %v2523_v55  ;;  %1580 = vmatmul.bf16.gmra.mxu3 %v2151_v60  ;;  %470 = vst [vmem:[#allocation2 + $0xb8] sm:$0xf] %v428_v46  ;;  %v2051_v55 = vor.u32 %v2481_v45, %v2050_v37  ;;  %v447_v60 = vshll.u32 %v2768_v19, 16  ;;  %v2086_v27 = vld [vmem:[#allocation2 + $0x50] sm:$0xf]  ;;  %v2572_v19 = vld [vmem:[%s3208_s1 + $0x1e0] sm:$0xff] }
  0x3e   : > { %1619 = vmatpush.bf16.msrb.mxu3 %v2531_v56  ;;  %1570 = vmatmul.bf16.gmra.mxu1 %v2079_v62  ;;  %567 = vst [vmem:[#allocation2 + $0xa0] sm:$0xf] %v428_v46  ;;  %v437_v56 = vrot.slane %v436_v50, 4  ;;  %v2566_v62 = vld [vmem:[%s3208_s1 + $0x1b0] sm:$0xff]  ;;  %v2094_v37 = vld [vmem:[#allocation2 + $0x58] sm:$0xf] }
  0x3f   : > { %1648 = vmatpush.bf16.msrb.mxu0 %v2539_v0  ;;  %1677 = vmatpush.bf16.msrb.mxu1 %v2547_v1  ;;  %612 = vst [vmem:[#allocation2 + $0x88] sm:$0xf] %v428_v46  ;;  %v2582_v0 = vld [vmem:[%s3208_s1 + $0x230] sm:$0xff]  ;;  %v2571_v44 = vld [vmem:[%s3208_s1 + $0x1d8] sm:$0xff] }
  0x40   : > { %581 = vst [vmem:[#allocation2 + $0x80] sm:$0xf] %v511_v30  ;;  %v442_v1 = vsel %vm2803_vm2, %v437_v56, %v441_v53  ;;  %v2490_v29 = vld [vmem:[#allocation2 + $0x70] sm:$0xf0]  ;;  %v2080_v35 = vld [vmem:[#allocation2 + $0x6c] sm:$0xf0] }
  0x41   : > { %1591 = vmatpush.bf16.msrb.mxu2 %v2522_v2  ;;  %582 = vst [vmem:[#allocation2 + $0xa4] sm:$0xf] %v515_v41  ;;  %v446_v2 = vrot.slane %v444_v59, 4  ;;  %v2486_v28 = vld [vmem:[#allocation2 + $0x54] sm:$0xf]  ;;  %v2579_v45 = vld [vmem:[%s3208_s1 + $0x218] sm:$0xff]  ;;  %v2087_v48 = vor.u32 %v2490_v29, %v2086_v27 }
  0x42   : > { %1620 = vmatpush.bf16.msrb.mxu3 %v2530_v3  ;;  %626 = vst [vmem:[#allocation2 + $0x68] sm:$0xf] %v511_v30  ;;  %v449_v3 = vrot.slane %v447_v60, 5  ;;  %v2088_v30 = vld [vmem:[#allocation2 + $0x74] sm:$0xf0]  ;;  %v2562_v53 = vld [vmem:[%s3208_s1 + $0x190] sm:$0xff] }
  0x43   : > { %1649 = vmatpush.bf16.msrb.mxu0 %v2538_v9  ;;  %1678 = vmatpush.bf16.msrb.mxu1 %v2546_v10  ;;  %627 = vst [vmem:[#allocation2 + $0x8c] sm:$0xf] %v515_v41  ;;  %v2581_v9 = vld [vmem:[%s3208_s1 + $0x228] sm:$0xff]  ;;  %v2563_v41 = vld [vmem:[%s3208_s1 + $0x198] sm:$0xff]  ;;  %v2091_v50 = vor.u32 %v2486_v28, %v2088_v30  ;;  %v2068_v28 = vld [vmem:[#allocation2 + $0x3c] sm:$0xf0] }
  0x44   : > { %568 = vst [vmem:[#allocation2 + $0xc4] sm:$0xf] %v442_v1  ;;  %v450_v10 = vor.u32 %v449_v3, %v446_v2  ;;  %v2553_v56 = vld [vmem:[%s3208_s1 + $0x148] sm:$0xff]  ;;  %v2116_v2 = vld [vmem:[#allocation2 + $0xb4] sm:$0xf0] }
  0x45   : > { %1592 = vmatpush.bf16.msrb.mxu2 %v2521_v11  ;;  %471 = vst [vmem:[#allocation2 + $0xdc] sm:$0xf] %v442_v1  ;;  %v1988_v11 = vrot.slane %v2764_v18, 9  ;;  %v2569_v59 = vld [vmem:[%s3208_s1 + $0x1c8] sm:$0xff]  ;;  %v2499_v3 = vld [vmem:[#allocation2 + $0xb8] sm:$0xf0] }
  0x46   : > { %1621 = vmatpush.bf16.msrb.mxu3 %v2529_v12  ;;  %v2556_v12 = vld [vmem:[%s3208_s1 + $0x160] sm:$0xff]  ;;  %613 = vst [vmem:[#allocation2 + $0xac] sm:$0xf] %v442_v1  ;;  %v2577_v60 = vld [vmem:[%s3208_s1 + $0x208] sm:$0xff]  ;;  %v2122_v1 = vld [vmem:[#allocation2 + $0x98] sm:$0xf] }
  0x47   : > { %1650 = vmatpush.bf16.msrb.mxu0 %v2537_v14  ;;  %1679 = vmatpush.bf16.msrb.mxu1 %v2545_v25  ;;  %v329_v14 = vld [vmem:[%s2728_s8 + $0x3c] sm:$0x1]  ;;  %v519_v18 = vsel %vm2825_vm5, %v1988_v11, %v518_v15  ;;  %547 = vst [vmem:[#allocation2 + $0x108] sm:$0xf] %v3036_v22  ;;  %v549_v25 = vshrl.u32 %v3036_v22, 16  ;;  %v2123_v11 = vor.u32 %v2499_v3, %v2122_v1 }
  0x48   : > { %v522_v21 = vrot.slane %v329_v14, 5  ;;  %538 = vst [vmem:[#allocation2 + $0xe0] sm:$0xf] %v519_v18  ;;  %v2074_v30 = vld [vmem:[#allocation2 + $0x20] sm:$0xf] }
  0x49   : > { %1593 = vmatpush.bf16.msrb.mxu2 %v2520_v16  ;;  %v451_v16 = vrot.slane %v450_v10, 4  ;;  %v551_v36 = vrot.slane %v549_v25, 4  ;;  %583 = vst [vmem:[#allocation2 + $0xc8] sm:$0xf] %v519_v18 }
  0x4a   : > { %1622 = vmatpush.bf16.msrb.mxu3 %v2528_v17  ;;  %v453_v17 = vshll.u32 %v329_v14, 16  ;;  %v523_v33 = vsel %vm2825_vm5, %v1989_v20, %v522_v21  ;;  %628 = vst [vmem:[#allocation2 + $0xb0] sm:$0xf] %v519_v18  ;;  %v2576_v14 = vld [vmem:[%s3208_s1 + $0x200] sm:$0xff] }
  0x4b   : > { %1651 = vmatpush.bf16.msrb.mxu0 %v2536_v7  ;;  %1680 = vmatpush.bf16.msrb.mxu1 %v2544_v38  ;;  %539 = vst [vmem:[#allocation2 + $0x104] sm:$0xf] %v523_v33  ;;  %v554_v7 = vrot.slane %v552_v24, 5  ;;  %v2491_v38 = vld [vmem:[#allocation2 + $0x78] sm:$0xf0] }
  0x4c   : > { %1594 = vmatmul.bf16.vlgmr.msrb.gmra.mxu2 %v2047_v54  ;;  %v455_v6 = vrot.slane %v453_v17, 5  ;;  %584 = vst [vmem:[#allocation2 + $0xec] sm:$0xf] %v523_v33  ;;  %v2503_v15 = vld [vmem:[#allocation2 + $0xdc] sm:$0xf] }
  0x4d   : > { %1702 = vmatpush.bf16.msra.mxu2 %v2559_v26  ;;  %1623 = vmatmul.bf16.vlgmr.msrb.gmra.mxu3 %v2051_v55  ;;  %v2485_v26 = vld [vmem:[#allocation2 + $0x4c] sm:$0xf]  ;;  %v555_v42 = vor.u32 %v554_v7, %v551_v36  ;;  %629 = vst [vmem:[#allocation2 + $0xd4] sm:$0xf] %v523_v33  ;;  %v2570_v55 = vld [vmem:[%s3208_s1 + $0x1d0] sm:$0xff] }
  0x4e   : > { %1731 = vmatpush.bf16.msra.mxu3 %v2567_v34  ;;  %1652 = vmatmul.bf16.vlgmr.msrb.gmra.mxu0 %v2055_v57  ;;  %v558_v34 = vshll.u32 %v3042_v23, 16  ;;  %v456_v39 = vsel %vm2803_vm2, %v451_v16, %v455_v6  ;;  %v2083_v46 = vor.u32 %v2485_v26, %v2080_v35  ;;  %592 = vst [vmem:[#allocation2 + $0xf0] sm:$0xf] %v3036_v22  ;;  %v2561_v57 = vld [vmem:[%s3208_s1 + $0x188] sm:$0xff]  ;;  %v2504_v21 = vld [vmem:[#allocation2 + $0xe4] sm:$0xf] }
  0x4f   : > { %1760 = vmatpush.bf16.msra.mxu0 %v2575_v51  ;;  %1789 = vmatpush.bf16.msra.mxu1 %v2583_v52  ;;  %472 = vst [vmem:[#allocation2 + $0x100] sm:$0xf] %v456_v39  ;;  %v556_v49 = vrot.slane %v555_v42, 4  ;;  %v2095_v51 = vor.u32 %v2491_v38, %v2094_v37  ;;  %v2554_v52 = vld [vmem:[%s3208_s1 + $0x150] sm:$0xff]  ;;  %v2158_v16 = vld [vmem:[#allocation2 + $0xe0] sm:$0xf] }
  0x50   : > { %1681 = vmatmul.bf16.vlgmr.msrb.gmra.mxu1 %v2059_v58  ;;  %v560_v43 = vrot.slane %v558_v34, 5  ;;  %569 = vst [vmem:[#allocation2 + $0xe8] sm:$0xf] %v456_v39  ;;  %v2578_v58 = vld [vmem:[%s3208_s1 + $0x210] sm:$0xff]  ;;  %v2160_v18 = vld [vmem:[#allocation2 + $0x104] sm:$0xf0] }
  0x51   : > { %1703 = vmatpush.bf16.msra.mxu2 %v2558_v61  ;;  %614 = vst [vmem:[#allocation2 + $0xd0] sm:$0xf] %v456_v39  ;;  %v2552_v61 = vld [vmem:[%s3208_s1 + $0x140] sm:$0xff]  ;;  %v2163_v29 = vor.u32 %v2504_v21, %v2160_v18  ;;  %v2060_v6 = vld [vmem:[#allocation2 + $0x34] sm:$0xf0] }
  0x52   : > { %1732 = vmatpush.bf16.msra.mxu3 %v2566_v62  ;;  %v561_v54 = vsel %vm2803_vm2, %v556_v49, %v560_v43  ;;  %v2560_v62 = vld [vmem:[%s3208_s1 + $0x180] sm:$0xff]  ;;  %v2066_v33 = vld [vmem:[#allocation2 + $0x18] sm:$0xf]  ;;  %v2483_v34 = vld [vmem:[#allocation2 + $0x38] sm:$0xf0] }
  0x53   : > { %1761 = vmatpush.bf16.msra.mxu0 %v2574_v63  ;;  %1790 = vmatpush.bf16.msra.mxu1 %v2582_v0  ;;  %570 = vst [vmem:[#allocation2 + $0x10c] sm:$0xf] %v561_v54  ;;  %v2568_v63 = vld [vmem:[%s3208_s1 + $0x1c0] sm:$0xff]  ;;  %v2494_v0 = vld [vmem:[#allocation2 + $0x94] sm:$0xf]  ;;  %v2067_v37 = vor.u32 %v2483_v34, %v2066_v33 }
  0x54   : > { %615 = vst [vmem:[#allocation2 + $0xf4] sm:$0xf] %v561_v54  ;;  %v2119_v10 = vor.u32 %v2494_v0, %v2116_v2  ;;  %v2508_v20 = vld [vmem:[#allocation2 + $0x100] sm:$0xf0]  ;;  %v2479_v35 = vld [vmem:[#allocation2 + $0x1c] sm:$0xf] }
  0x55   : > { %1704 = vmatpush.bf16.msra.mxu2 %v2557_v4  ;;  %v2495_v4 = vld [vmem:[#allocation2 + $0x9c] sm:$0xf]  ;;  %v2159_v27 = vor.u32 %v2508_v20, %v2158_v16  ;;  %v2484_v36 = vld [vmem:[#allocation2 + $0x40] sm:$0xf0]  ;;  %v2071_v38 = vor.u32 %v2479_v35, %v2068_v28  ;;  %v333_v43 = vld [vmem:[%s2728_s8 + $0x4c] sm:$0x1] }
  0x56   : > { %1733 = vmatpush.bf16.msra.mxu3 %v2565_v5  ;;  %v2124_v5 = vld [vmem:[#allocation2 + $0xbc] sm:$0xf0]  ;;  %v2075_v39 = vor.u32 %v2484_v36, %v2074_v30  ;;  %v604_v49 = vshll.u32 %v333_v43, 16  ;;  %v2487_v54 = vld [vmem:[#allocation2 + $0x5c] sm:$0xf] }
  0x57   : > { %1762 = vmatpush.bf16.msra.mxu0 %v2573_v8  ;;  %1791 = vmatpush.bf16.msra.mxu1 %v2581_v9  ;;  %v2130_v8 = vld [vmem:[#allocation2 + $0xa0] sm:$0xf]  ;;  %v2500_v9 = vld [vmem:[#allocation2 + $0xc0] sm:$0xf0]  ;;  %v2166_v25 = vld [vmem:[#allocation2 + $0xe8] sm:$0xf] }
  0x58   : > { %v2152_v17 = vld [vmem:[#allocation2 + $0xfc] sm:$0xf0]  ;;  %v2132_v32 = vld [vmem:[#allocation2 + $0xc4] sm:$0xf0]  ;;  %v2502_v47 = vld [vmem:[#allocation2 + $0xd0] sm:$0xf0] }
  0x59   : > { %1705 = vmatpush.bf16.msra.mxu2 %v2556_v12  ;;  %v2127_v12 = vor.u32 %v2495_v4, %v2124_v5  ;;  %v2155_v26 = vor.u32 %v2503_v15, %v2152_v17  ;;  %v2496_v4 = vld [vmem:[#allocation2 + $0xa4] sm:$0xf]  ;;  %v2138_v5 = vld [vmem:[#allocation2 + $0xa8] sm:$0xf] }
  0x5a   : > { %1734 = vmatpush.bf16.msra.mxu3 %v2564_v13  ;;  %v2131_v13 = vor.u32 %v2500_v9, %v2130_v8  ;;  %v2509_v24 = vld [vmem:[#allocation2 + $0x108] sm:$0xf0] }
  0x5b   : > { %1763 = vmatpush.bf16.msra.mxu0 %v2572_v19  ;;  %1792 = vmatpush.bf16.msra.mxu1 %v2580_v31  ;;  %v2167_v19 = vor.u32 %v2509_v24, %v2166_v25  ;;  %v2478_v31 = vld [vmem:[#allocation2 + $0x14] sm:$0xf]  ;;  %v2501_v8 = vld [vmem:[#allocation2 + $0xc8] sm:$0xf0] }
  0x5c   : > { %1599 = vmatmul.bf16.gmra.mxu2 %v2083_v46  ;;  %v2063_v7 = vor.u32 %v2478_v31, %v2060_v6  ;;  %v1990_v46 = vrot.slane %v3036_v22, 9  ;;  %v2497_v9 = vld [vmem:[#allocation2 + $0xac] sm:$0xf]  ;;  %v2174_v31 = vld [vmem:[#allocation2 + $0xf0] sm:$0xf] }
  0x5d   : > { %1706 = vmatpush.bf16.msra.mxu2 %v2555_v40  ;;  %1628 = vmatmul.bf16.gmra.mxu3 %v2087_v48  ;;  %v332_v40 = vld [vmem:[%s2728_s8 + $0x48] sm:$0xf]  ;;  %v575_v48 = vrot.slane %v3042_v23, 5  ;;  %v2506_v33 = vld [vmem:[#allocation2 + $0xf4] sm:$0xf]  ;;  %s2475_s8 = sshll.u32 %s3221_s15, 6 }
  0x5e   : > { %1735 = vmatpush.bf16.msra.mxu3 %v2563_v41  ;;  %1657 = vmatmul.bf16.gmra.mxu0 %v2091_v50  ;;  %593 = vst [vmem:[#allocation2 + $0x114] sm:$0xf] %v332_v40  ;;  %v595_v41 = vshrl.u32 %v332_v40, 16  ;;  %v598_v42 = vshll.u32 %v332_v40, 16  ;;  %v2104_v23 = vld [vmem:[#allocation2 + $0x84] sm:$0xf0]  ;;  %s3168_s21 = scalar_lea.vmem %s3211_s4, %s2475_s8 }
  0x5f   : > { %1764 = vmatpush.bf16.msra.mxu0 %v2571_v44  ;;  %1793 = vmatpush.bf16.msra.mxu1 %v2579_v45 }
  0x60   : > { %1686 = vmatmul.bf16.gmra.mxu1 %v2095_v51  ;;  %v597_v44 = vrot.slane %v595_v41, 4  ;;  %v600_v45 = vrot.slane %v598_v42, 5  ;;  %v576_v51 = vsel %vm2825_vm5, %v1990_v46, %v575_v48 }
  0x61   : > { %1707 = vmatpush.bf16.msra.mxu2 %v2554_v52  ;;  %v606_v52 = vrot.slane %v604_v49, 5  ;;  %585 = vst [vmem:[#allocation2 + $0x110] sm:$0xf] %v576_v51 }
  0x62   : > { %1736 = vmatpush.bf16.msra.mxu3 %v2562_v53  ;;  %v601_v50 = vor.u32 %v600_v45, %v597_v44  ;;  %630 = vst [vmem:[#allocation2 + $0xf8] sm:$0xf] %v576_v51 }
  0x63   : > { %1765 = vmatpush.bf16.msra.mxu0 %v2570_v55  ;;  %1794 = vmatpush.bf16.msra.mxu1 %v2578_v58  ;;  %v1991_v55 = vrot.slane %v332_v40, 9  ;;  %v2102_v58 = vld [vmem:[#allocation2 + $0x60] sm:$0xf] }
  0x64   : > { %v602_v53 = vrot.slane %v601_v50, 4 }
  0x65   : > { %1708 = vmatpush.bf16.msra.mxu2 %v2553_v56  ;;  %v621_v56 = vrot.slane %v333_v43, 5  ;;  %v2510_v6 = vld [vmem:[#allocation2 + $0x110] sm:$0xf0] }
  0x66   : > { %1737 = vmatpush.bf16.msra.mxu3 %v2561_v57  ;;  %v2096_v57 = vld [vmem:[#allocation2 + $0x7c] sm:$0xf0]  ;;  %v607_v22 = vsel %vm2803_vm2, %v602_v53, %v606_v52 }
  0x67   : > { %1766 = vmatpush.bf16.msra.mxu0 %v2569_v59  ;;  %1795 = vmatpush.bf16.msra.mxu1 %v2577_v60  ;;  %v2492_v59 = vld [vmem:[#allocation2 + $0x80] sm:$0xf0]  ;;  %616 = vst [vmem:[#allocation2 + $0x118] sm:$0xf] %v607_v22  ;;  %v2099_v0 = vor.u32 %v2487_v54, %v2096_v57 }
  0x68   : > { %v2488_v60 = vld [vmem:[#allocation2 + $0x64] sm:$0xf]  ;;  %v2103_v1 = vor.u32 %v2492_v59, %v2102_v58 }
  0x69   : > { %1709 = vmatpush.bf16.msra.mxu2 %v2552_v61  ;;  %v622_v61 = vsel %vm2825_vm5, %v1991_v55, %v621_v56  ;;  %v2107_v2 = vor.u32 %v2488_v60, %v2104_v23  ;;  %v2182_v35 = vld [vmem:[#allocation2 + $0xf8] sm:$0xf] }
  0x6a   : > { %1738 = vmatpush.bf16.msra.mxu3 %v2560_v62  ;;  %v2110_v62 = vld [vmem:[#allocation2 + $0x68] sm:$0xf]  ;;  %631 = vst [vmem:[#allocation2 + $0x11c] sm:$0xf] %v622_v61 }
  0x6b   : > { %1767 = vmatpush.bf16.msra.mxu0 %v2568_v63  ;;  %1796 = vmatpush.bf16.msra.mxu1 %v2576_v14  ;;  %v2493_v63 = vld [vmem:[#allocation2 + $0x88] sm:$0xf0] }
  0x6c   : > { %1604 = vmatmul.bf16.gmra.mxu2 %v2119_v10  ;;  %v2111_v3 = vor.u32 %v2493_v63, %v2110_v62  ;;  %v2140_v10 = vld [vmem:[#allocation2 + $0xcc] sm:$0xf0] }
  0x6d   : > { %1633 = vmatmul.bf16.gmra.mxu3 %v2123_v11  ;;  %v2146_v11 = vld [vmem:[#allocation2 + $0xb0] sm:$0xf]  ;;  %v2143_v14 = vor.u32 %v2497_v9, %v2140_v10 }
  0x6e   : > { %1662 = vmatmul.bf16.gmra.mxu0 %v2127_v12  ;;  %v2135_v12 = vor.u32 %v2496_v4, %v2132_v32  ;;  %v2147_v15 = vor.u32 %v2502_v47, %v2146_v11  ;;  %v2176_v34 = vld [vmem:[#allocation2 + $0x114] sm:$0xf0] }
  0x70   : > { %1691 = vmatmul.bf16.gmra.mxu1 %v2131_v13  ;;  %v2139_v13 = vor.u32 %v2501_v8, %v2138_v5 }
  0x71   : > { %v2511_v28 = vld [vmem:[#allocation2 + $0x118] sm:$0xf0] }
  0x72   : > { %v2183_v40 = vor.u32 %v2511_v28, %v2182_v35 }
  0x7c   : > { %1609 = vmatmul.bf16.gmra.mxu2 %v2155_v26 }
  0x7d   : > { %1638 = vmatmul.bf16.gmra.mxu3 %v2159_v27 }
  0x7e   : > { %1667 = vmatmul.bf16.gmra.mxu0 %v2163_v29  ;;  %v2505_v29 = vld [vmem:[#allocation2 + $0xec] sm:$0xf] }
  0x80   : > { %1696 = vmatmul.bf16.gmra.mxu1 %v2167_v19  ;;  %v2168_v19 = vld [vmem:[#allocation2 + $0x10c] sm:$0xf0] }
  0x8c   : > { %1710 = vmatmul.bf16.vlgmr.msra.gmra.mxu2 %v2063_v7 }
  0x8d   : > { %1739 = vmatmul.bf16.vlgmr.msra.gmra.mxu3 %v2067_v37  ;;  %v2171_v37 = vor.u32 %v2505_v29, %v2168_v19 }
  0x8e   : > { %1768 = vmatmul.bf16.vlgmr.msra.gmra.mxu0 %v2071_v38  ;;  %v2175_v38 = vor.u32 %v2510_v6, %v2174_v31 }
  0x90   : > { %1797 = vmatmul.bf16.vlgmr.msra.gmra.mxu1 %v2075_v39  ;;  %v2179_v39 = vor.u32 %v2506_v33, %v2176_v34 }
  0x9c   : > { %1715 = vmatmul.bf16.gmra.mxu2 %v2099_v0 }
  0x9d   : > { %1744 = vmatmul.bf16.gmra.mxu3 %v2103_v1 }
  0x9e   : > { %1773 = vmatmul.bf16.gmra.mxu0 %v2107_v2 }
  0xa0   : > { %1802 = vmatmul.bf16.gmra.mxu1 %v2111_v3 }
  0xa9   : > { %v921_v16 = vpop.f32.mrf.mxu0 }
  0xab   : > { %v1566_v17 = vpop.f32.mrf.mxu1 }
  0xac   : > { %v3118_v20 = vadd.f32 %v1566_v17, %v921_v16  ;;  %1720 = vmatmul.bf16.gmra.mxu2 %v2135_v12 }
  0xad   : > { %1749 = vmatmul.bf16.gmra.mxu3 %v2139_v13 }
  0xae   : > { %1778 = vmatmul.bf16.gmra.mxu0 %v2143_v14 }
  0xaf   : > { %v931_v21 = vpop.f32.mrf.mxu2 }
  0xb0   : > { %1807 = vmatmul.bf16.gmra.mxu1 %v2147_v15  ;;  %v1576_v18 = vpop.f32.mrf.mxu3 }
  0xb1   : > { %v3120_v25 = vadd.f32 %v1576_v18, %v931_v21  ;;  %v923_v24 = vpop.f32.mrf.mxu0 }
  0xb3   : > { %v1568_v26 = vpop.f32.mrf.mxu1 }
  0xb4   : > { %v3122_v27 = vadd.f32 %v1568_v26, %v923_v24 }
  0xb7   : > { %v933_v30 = vpop.f32.mrf.mxu2 }
  0xb8   : > { %v1578_v36 = vpop.f32.mrf.mxu3 }
  0xb9   : > { %v3124_v7 = vadd.f32 %v1578_v36, %v933_v30  ;;  %v926_v41 = vpop.f32.mrf.mxu0 }
  0xbb   : > { %v1571_v42 = vpop.f32.mrf.mxu1 }
  0xbc   : > { %v1572_v43 = vadd.f32 %v1571_v42, %v926_v41  ;;  %1725 = vmatmul.bf16.gmra.mxu2 %v2171_v37 }
  0xbd   : > { %1754 = vmatmul.bf16.gmra.mxu3 %v2175_v38 }
  0xbe   : > { %1783 = vmatmul.bf16.gmra.mxu0 %v2179_v39 }
  0xbf   : > { %v936_v44 = vpop.f32.mrf.mxu2 }
  0xc0   : > { %1812 = vmatmul.bf16.gmra.mxu1 %v2183_v40  ;;  %v1581_v45 = vpop.f32.mrf.mxu3 }
  0xc1   : > { %v3126_v46 = vadd.f32 %v1581_v45, %v936_v44  ;;  %v928_v48 = vpop.f32.mrf.mxu0 }
  0xc3   : > { %v1573_v49 = vpop.f32.mrf.mxu1 }
  0xc4   : > { %v3128_v50 = vadd.f32 %v1573_v49, %v928_v48 }
  0xc7   : > { %v938_v51 = vpop.f32.mrf.mxu2 }
  0xc8   : > { %v1583_v52 = vpop.f32.mrf.mxu3 }
  0xc9   : > { %v3130_v53 = vadd.f32 %v1583_v52, %v938_v51 }
  0xcb   : > { %v1653_v54 = vpop.f32.mrf.mxu0 }
  0xcd   : > { %v1682_v55 = vpop.f32.mrf.mxu1 }
  0xcf   : > { %v1595_v56 = vpop.f32.mrf.mxu2 }
  0xd0   : > { %v1624_v57 = vpop.f32.mrf.mxu3  ;;  %v1596_v16 = vadd.f32 %v1595_v56, %v3118_v20 }
  0xd2   : > { %v1625_v18 = vadd.f32 %v1624_v57, %v1596_v16 }
  0xd3   : > { %v1655_v58 = vpop.f32.mrf.mxu0 }
  0xd4   : > { %v1654_v29 = vadd.f32 %v1653_v54, %v1625_v18 }
  0xd5   : > { %v1684_v59 = vpop.f32.mrf.mxu1 }
  0xd6   : > { %v1683_v34 = vadd.f32 %v1682_v55, %v1654_v29 }
  0xd7   : > { %v1597_v22 = vpop.f32.mrf.mxu2 }
  0xd8   : > { %v1626_v60 = vpop.f32.mrf.mxu3  ;;  %v1598_v19 = vadd.f32 %v1597_v22, %v3122_v27 }
  0xda   : > { %v1627_v33 = vadd.f32 %v1626_v60, %v1598_v19 }
  0xdb   : > { %v1658_v23 = vpop.f32.mrf.mxu0 }
  0xdc   : > { %v1656_v30 = vadd.f32 %v1655_v58, %v1627_v33 }
  0xdd   : > { %v1687_v61 = vpop.f32.mrf.mxu1 }
  0xde   : > { %v1685_v42 = vadd.f32 %v1684_v59, %v1656_v30 }
  0xdf   : > { %v1600_v62 = vpop.f32.mrf.mxu2 }
  0xe0   : > { %v1629_v63 = vpop.f32.mrf.mxu3  ;;  %v1601_v36 = vadd.f32 %v1600_v62, %v1572_v43 }
  0xe2   : > { %v1630_v27 = vadd.f32 %v1629_v63, %v1601_v36 }
  0xe3   : > { %v1660_v0 = vpop.f32.mrf.mxu0 }
  0xe4   : > { %v1659_v43 = vadd.f32 %v1658_v23, %v1630_v27 }
  0xe5   : > { %v3132_v1 = vpop.f32.mrf.mxu1 }
  0xe6   : > { %v1688_v58 = vadd.f32 %v1687_v61, %v1659_v43 }
  0xe7   : > { %v1602_v2 = vpop.f32.mrf.mxu2 }
  0xe8   : > { %v1631_v3 = vpop.f32.mrf.mxu3  ;;  %v1603_v49 = vadd.f32 %v1602_v2, %v3128_v50 }
  0xea   : > { %v1632_v56 = vadd.f32 %v1631_v3, %v1603_v49 }
  0xeb   : > { %v3134_v4 = vpop.f32.mrf.mxu0 }
  0xec   : > { %v1661_v62 = vadd.f32 %v1660_v0, %v1632_v56 }
  0xed   : > { %v3136_v32 = vpop.f32.mrf.mxu1 }
  0xee   : > { %v1690_v19 = vadd.f32 %v3132_v1, %v1661_v62 }
  0xef   : > { %v1605_v5 = vpop.f32.mrf.mxu2 }
  0xf0   : > { %v1634_v8 = vpop.f32.mrf.mxu3  ;;  %v1606_v63 = vadd.f32 %v1605_v5, %v3120_v25 }
  0xf2   : > { %v1635_v50 = vadd.f32 %v1634_v8, %v1606_v63 }
  0xf3   : > { %v3138_v9 = vpop.f32.mrf.mxu0 }
  0xf5   : > { %v3140_v10 = vpop.f32.mrf.mxu1 }
  0xf7   : > { %v3142_v11 = vpop.f32.mrf.mxu2 }
  0xf8   : > { %v3144_v47 = vpop.f32.mrf.mxu3  ;;  %v1608_v0 = vadd.f32 %v3142_v11, %v3124_v7 }
  0xfb   : > { %v3146_v12 = vpop.f32.mrf.mxu0 }
  0xfd   : > { %v3148_v13 = vpop.f32.mrf.mxu1 }
  0xff   : > { %v3150_v14 = vpop.f32.mrf.mxu2 }
 0x100   : > { %v3152_v15 = vpop.f32.mrf.mxu3 }
 0x103   : > { %v3155_v17 = vpop.f32.mrf.mxu0 }
 0x105   : > { %v3157_v21 = vpop.f32.mrf.mxu1 }
 0x107   : > { %v3159_v24 = vpop.f32.mrf.mxu2 }
 0x108   : > { %v3161_v26 = vpop.f32.mrf.mxu3 }
 0x10b   : > { %v1769_v31 = vpop.f32.mrf.mxu0 }
 0x10d   : > { %v1798_v6 = vpop.f32.mrf.mxu1 }
 0x10f   : > { %v1711_v35 = vpop.f32.mrf.mxu2 }
 0x110   : > { %v1740_v28 = vpop.f32.mrf.mxu3  ;;  %v1712_v20 = vadd.f32 %v1711_v35, %v1683_v34  ;;  %v1637_v34 = vadd.f32 %v3144_v47, %v1608_v0 }
 0x112   : > { %v1741_v37 = vadd.f32 %v1740_v28, %v1712_v20  ;;  %v1666_v36 = vadd.f32 %v3138_v9, %v1637_v34  ;;  %v1613_v9 = vadd.f32 %v3159_v24, %v3130_v53 }
 0x113   : > { %v1771_v38 = vpop.f32.mrf.mxu0 }
 0x114   : > { %v1770_v40 = vadd.f32 %v1769_v31, %v1741_v37 }
 0x115   : > { %v1800_v39 = vpop.f32.mrf.mxu1 }
 0x116   : > { %v1799_v41 = vadd.f32 %v1798_v6, %v1770_v40  ;;  %v1664_v6 = vadd.f32 %v3134_v4, %v1635_v50  ;;  %v1611_v4 = vadd.f32 %v3150_v14, %v3126_v46 }
 0x117   : > { %v1713_v44 = vpop.f32.mrf.mxu2 }
 0x118   : > { %v1742_v45 = vpop.f32.mrf.mxu3  ;;  %1818 = vst [vmem:[%s3168_s21] sm:$0xff] %v1799_v41  ;;  %v1714_v48 = vadd.f32 %v1713_v44, %v1685_v42  ;;  %v1693_v1 = vadd.f32 %v3136_v32, %v1664_v6  ;;  %v1640_v37 = vadd.f32 %v3152_v15, %v1611_v4  ;;  %v1642_v15 = vadd.f32 %v3161_v26, %v1613_v9 }
 0x11a   : > { %v1743_v51 = vadd.f32 %v1742_v45, %v1714_v48  ;;  %v1669_v42 = vadd.f32 %v3146_v12, %v1640_v37 }
 0x11b   : > { %v1774_v52 = vpop.f32.mrf.mxu0 }
 0x11c   : > { %v1772_v55 = vadd.f32 %v1771_v38, %v1743_v51  ;;  %v1698_v45 = vadd.f32 %v3148_v13, %v1669_v42  ;;  %v1671_v51 = vadd.f32 %v3155_v17, %v1642_v15 }
 0x11d   : > { %v1803_v54 = vpop.f32.mrf.mxu1 }
 0x11e   : > { %v1801_v57 = vadd.f32 %v1800_v39, %v1772_v55  ;;  %v1695_v39 = vadd.f32 %v3140_v10, %v1666_v36  ;;  %v1700_v24 = vadd.f32 %v3157_v21, %v1671_v51 }
 0x11f   : > { %v1716_v22 = vpop.f32.mrf.mxu2 }
 0x120   : > { %v1745_v60 = vpop.f32.mrf.mxu3  ;;  %1819 = vst [vmem:[%s3168_s21 + $0x8] sm:$0xff] %v1801_v57  ;;  %v1717_v59 = vadd.f32 %v1716_v22, %v1688_v58 }
 0x122   : > { %v1746_v16 = vadd.f32 %v1745_v60, %v1717_v59 }
 0x123   : > { %v1776_v18 = vpop.f32.mrf.mxu0 }
 0x124   : > { %v1775_v23 = vadd.f32 %v1774_v52, %v1746_v16 }
 0x125   : > { %v1805_v29 = vpop.f32.mrf.mxu1 }
 0x126   : > { %v1804_v2 = vadd.f32 %v1803_v54, %v1775_v23 }
 0x127   : > { %v1718_v3 = vpop.f32.mrf.mxu2 }
 0x128   : > { %v1747_v31 = vpop.f32.mrf.mxu3  ;;  %1820 = vst [vmem:[%s3168_s21 + $0x10] sm:$0xff] %v1804_v2  ;;  %v1719_v61 = vadd.f32 %v1718_v3, %v1690_v19 }
 0x12a   : > { %v1748_v33 = vadd.f32 %v1747_v31, %v1719_v61 }
 0x12b   : > { %v1779_v5 = vpop.f32.mrf.mxu0 }
 0x12c   : > { %v1777_v25 = vadd.f32 %v1776_v18, %v1748_v33 }
 0x12d   : > { %v1808_v8 = vpop.f32.mrf.mxu1 }
 0x12e   : > { %v1806_v35 = vadd.f32 %v1805_v29, %v1777_v25 }
 0x12f   : > { %v1721_v28 = vpop.f32.mrf.mxu2 }
 0x130   : > { %v1750_v20 = vpop.f32.mrf.mxu3  ;;  %1821 = vst [vmem:[%s3168_s21 + $0x18] sm:$0xff] %v1806_v35  ;;  %v1722_v30 = vadd.f32 %v1721_v28, %v1693_v1 }
 0x132   : > { %v1751_v7 = vadd.f32 %v1750_v20, %v1722_v30 }
 0x133   : > { %v1781_v47 = vpop.f32.mrf.mxu0 }
 0x134   : > { %v1780_v11 = vadd.f32 %v1779_v5, %v1751_v7 }
 0x135   : > { %v1810_v41 = vpop.f32.mrf.mxu1 }
 0x136   : > { %v1809_v38 = vadd.f32 %v1808_v8, %v1780_v11 }
 0x137   : > { %v1723_v40 = vpop.f32.mrf.mxu2 }
 0x138   : > { %v1752_v32 = vpop.f32.mrf.mxu3  ;;  %1822 = vst [vmem:[%s3168_s21 + $0x20] sm:$0xff] %v1809_v38  ;;  %v1724_v27 = vadd.f32 %v1723_v40, %v1695_v39 }
 0x13a   : > { %v1753_v46 = vadd.f32 %v1752_v32, %v1724_v27 }
 0x13b   : > { %v1784_v49 = vpop.f32.mrf.mxu0 }
 0x13c   : > { %v1782_v14 = vadd.f32 %v1781_v47, %v1753_v46 }
 0x13d   : > { %v1813_v52 = vpop.f32.mrf.mxu1 }
 0x13e   : > { %v1811_v44 = vadd.f32 %v1810_v41, %v1782_v14 }
 0x13f   : > { %v1726_v48 = vpop.f32.mrf.mxu2 }
 0x140   : > { %v1755_v10 = vpop.f32.mrf.mxu3  ;;  %1823 = vst [vmem:[%s3168_s21 + $0x28] sm:$0xff] %v1811_v44  ;;  %v1727_v43 = vadd.f32 %v1726_v48, %v1698_v45 }
 0x142   : > { %v1756_v12 = vadd.f32 %v1755_v10, %v1727_v43 }
 0x143   : > { %v1786_v13 = vpop.f32.mrf.mxu0 }
 0x144   : > { %v1785_v54 = vadd.f32 %v1784_v49, %v1756_v12 }
 0x145   : > { %v1815_v22 = vpop.f32.mrf.mxu1 }
 0x146   : > { %v1814_v53 = vadd.f32 %v1813_v52, %v1785_v54 }
 0x147   : > { %v1728_v55 = vpop.f32.mrf.mxu2 }
 0x148   : > { %1824 = vst [vmem:[%s3168_s21 + $0x30] sm:$0xff] %v1814_v53  ;;  %v1729_v26 = vadd.f32 %v1728_v55, %v1700_v24  ;;  %v1757_v56 = vpop.f32.mrf.mxu3 }
 0x14a   : > { %v1758_v57 = vadd.f32 %v1757_v56, %v1729_v26 }
 0x14c   : > { %v1787_v58 = vadd.f32 %v1786_v13, %v1758_v57 }
 0x14e   : > { %v1816_v60 = vadd.f32 %v1815_v22, %v1787_v58 }
 0x150   : > { %1825 = vst [vmem:[%s3168_s21 + $0x38] sm:$0xff] %v1816_v60 }
 0x151 PF: > { %s14_s17 = sadd.s32 1, %s2659_s17   ;;  %s3216_s15 = smov %s2655_s16 }
 0x152   : > { %p11_p5 = scmp.ge.s32.totalorder %s14_s17, 4   ;;  %s3217_s16 = smov %s3219_s18 }
 0x154   :  { %13 = sbr.rel (!%p11_p5) target bundleno = 2 (0x2), region = 80 }

</bundles_post_ra>
